<compile_context>
chip_gen: v6e
topology: v6e:2x2x1
jax: 0.10.0
libtpu: 0.0.40
codegen_flags: <defaults>
</compile_context>

<pallas_src>
import functools

import numpy as np

import jax
import jax.numpy as jnp
from jax.experimental import pallas as pl
from jax.experimental.pallas import tpu as pltpu

# ----------------------------- config (scaled-down) -----------------------------
BATCH = 2
MAXLEN = 24            # original: 350 (multiple of 8 for sublane alignment)
VOCAB = 100            # original: 30000
EMB_DIM = 32           # original: 300
NUM_KERNELS = 16       # original: 64
KERNEL_SIZES = [2, 3, 4, 5]
HIDDEN = 64            # original: 1024
NUM_CLASSES = 4
BN_EPS = 1e-5          # PyTorch BatchNorm1d default eps

KMAX = max(KERNEL_SIZES)
CP = 128               # conv out-channels zero-padded to one full lane width


def _round_up(x, m):
    return (x + m - 1) // m * m


# ----------------------------- in-kernel helpers ---------------------------------
def _bn_relu(y, bn, inv_count, mask):
    """Train-mode BatchNorm1d (biased variance) + ReLU over the row axis of a
    (rows, C) slab, one-pass statistics (sum / sum-of-squares).

    If `mask` is not None, statistics use only rows with mask==1 and `inv_count`
    must be 1/num_valid_rows.  Zero-padded channels carry gamma=beta=0 and stay
    exactly zero.  All statistics/normalization in f32.
    """
    gamma = bn[0:1, :]
    beta = bn[1:2, :]
    ym = y if mask is None else y * mask
    mean = jnp.sum(ym, axis=0, keepdims=True) * inv_count
    var = jnp.sum(ym * y, axis=0, keepdims=True) * inv_count - mean * mean
    return jnp.maximum((y - mean) * jax.lax.rsqrt(var + BN_EPS) * gamma + beta, 0.0)


def _textcnn_kernel(ks_ref, x_ref, w1_ref, w2_ref, bn1_ref, bn2_ref,
                    wfc1_ref, bnfc_ref, wfc2_ref, bfc2_ref,
                    o_ref, hacc_ref, *, batch, seq_len):
    """One grid step == one conv branch (Conv1d->BN->ReLU->Conv1d->BN->ReLU->MaxPool
    + partial FC), with the FC head finalized on the last branch."""
    b = pl.program_id(0)
    n = batch * seq_len
    r1 = _round_up(n + KMAX - 1, 16)        # rows computed by conv1 (static)
    k = ks_ref[b]                           # this branch's Conv1d kernel size (SMEM)
    l1 = seq_len - k + 1                    # valid conv1 output length per sample
    l2 = seq_len - 2 * k + 2                # valid conv2 output length per sample

    @pl.when(b == 0)
    def _init():
        hacc_ref[...] = jnp.zeros_like(hacc_ref)

    # Row-validity masks built in-kernel from iota compares (no HBM mask arrays).
    # A flattened row is a valid conv output iff its window stays inside its sample.
    row1 = jax.lax.broadcasted_iota(jnp.int32, (r1, 1), 0)
    row2 = jax.lax.broadcasted_iota(jnp.int32, (n, 1), 0)
    m1 = row1 < n
    m2 = row2 < n
    for j in range(batch):                  # static & tiny; thresholds are traced
        end = (j + 1) * seq_len
        m1 = jnp.logical_and(m1, jnp.logical_or(row1 < j * seq_len + l1, row1 >= end))
        m2 = jnp.logical_and(m2, jnp.logical_or(row2 < j * seq_len + l2, row2 >= end))
    m1 = m1.astype(jnp.float32)
    m2 = m2.astype(jnp.float32)

    # ---- conv1: shift-and-accumulate over KMAX taps into ONE f32 accumulator.
    # Taps >= k carry all-zero weight slabs, so the padded taps are exact no-ops.
    # (At original scale Cin=300 already fills the MXU; tap packing not needed here.)
    xf = x_ref[...].astype(jnp.float32)     # one aligned load of the bf16 x slab
    y1 = jnp.zeros((r1, CP), jnp.float32)
    for d in range(KMAX):
        y1 = y1 + jnp.dot(xf[d:d + r1, :].astype(jnp.bfloat16), w1_ref[0, d],
                          preferred_element_type=jnp.float32)
    h1 = _bn_relu(y1, bn1_ref[0], 1.0 / (batch * l1).astype(jnp.float32), m1) * m1

    # ---- conv2: tap-packed in-VMEM "im2col" (128-lane-aligned concat), single bf16
    # cast of the packed operand, one MXU dot with contraction depth KMAX*CP = 640.
    # h1 never touches HBM.
    h1_pack = jnp.concatenate([h1[d:d + n, :] for d in range(KMAX)], axis=1)
    y2 = jnp.dot(h1_pack.astype(jnp.bfloat16), w2_ref[0],
                 preferred_element_type=jnp.float32)
    h2 = _bn_relu(y2, bn2_ref[0], 1.0 / (batch * l2).astype(jnp.float32), m2) * m2

    # ---- global MaxPool1d: zeroed invalid rows can't win the max (ReLU >= 0).
    pooled = jnp.max(h2.reshape(batch, seq_len, CP), axis=1)        # (batch, CP)

    # ---- torch.cat + first Linear == sum over branches of pooled_b @ W1[rows_b].
    hacc_ref[...] += jnp.dot(pooled.astype(jnp.bfloat16), wfc1_ref[0],
                             preferred_element_type=jnp.float32)

    @pl.when(b == pl.num_programs(0) - 1)
    def _finalize():                        # BN -> ReLU -> Linear, lane-dense store
        h = hacc_ref[...]
        hn = _bn_relu(h, bnfc_ref[...], 1.0 / batch, None)
        o_ref[...] = jnp.dot(hn.astype(jnp.bfloat16), wfc2_ref[...],
                             preferred_element_type=jnp.float32) + bfc2_ref[...]


# ----------------------------- forward (single fused pallas_call) -----------------
def textcnn_forward(params, tokens):
    """tokens: (B, L) int32  ->  logits (B, NUM_CLASSES)."""
    batch, seq_len = tokens.shape
    assert seq_len % 8 == 0, "pad maxlen to a multiple of 8 (sublane alignment)"
    assert seq_len - 2 * (KMAX - 1) > 0, "sequence too short for the largest kernel"
    n = batch * seq_len
    r1 = _round_up(n + KMAX - 1, 16)
    nx = _round_up(r1 + KMAX - 1, 16)
    nb = len(KERNEL_SIZES)

    # Embedding lookup stays plain-JAX glue (row gather); x moves to the kernel as a
    # single bf16 slab (half the HBM bytes of f32).  Zero tail rows give the shifted
    # in-kernel conv views room; they are masked out of all statistics.
    # TODO(synk): at original scale, fold this gather into the kernel with scalar-
    # prefetched token ids (pl.Element row gather) and keep the table in bf16.
    emb = params["embedding"][tokens].reshape(n, EMB_DIM)
    x = jnp.pad(emb, ((0, nx - n), (0, 0))).astype(jnp.bfloat16)

    pk = params["packed"]
    ks = jnp.asarray(KERNEL_SIZES, jnp.int32)
    kern = functools.partial(_textcnn_kernel, batch=batch, seq_len=seq_len)

    # TODO(synk): at original scale (maxlen=350, emb_dim=300, larger batch) add a
    # second, row-tiled "arbitrary" grid axis with two-pass BN (sum/sum-sq VMEM
    # accumulators) so activations stream through tiles sized for v7x's 64 MiB VMEM
    # (vmem_limit_bytes), instead of holding the whole flattened batch in one block.
    grid_spec = pltpu.PrefetchScalarGridSpec(
        num_scalar_prefetch=1,
        grid=(nb,),
        in_specs=[
            # x: constant index map -> DMA'd into VMEM exactly once for all branches.
            pl.BlockSpec((nx, EMB_DIM), lambda b, s: (0, 0)),
            # per-branch weights / BN params: streamed (double-buffered) per branch.
            pl.BlockSpec((1, KMAX, EMB_DIM, CP), lambda b, s: (b, 0, 0, 0)),
            pl.BlockSpec((1, KMAX * CP, CP), lambda b, s: (b, 0, 0)),
            pl.BlockSpec((1, 2, CP), lambda b, s: (b, 0, 0)),
            pl.BlockSpec((1, 2, CP), lambda b, s: (b, 0, 0)),
            pl.BlockSpec((1, CP, HIDDEN), lambda b, s: (b, 0, 0)),
            # FC head params: constant index maps -> resident across the grid.
            pl.BlockSpec((2, HIDDEN), lambda b, s: (0, 0)),
            pl.BlockSpec((HIDDEN, CP), lambda b, s: (0, 0)),
            pl.BlockSpec((1, CP), lambda b, s: (0, 0)),
        ],
        out_specs=pl.BlockSpec((batch, CP), lambda b, s: (0, 0)),
        scratch_shapes=[pltpu.VMEM((batch, HIDDEN), jnp.float32)],
    )
    out = pl.pallas_call(
        kern,
        out_shape=jax.ShapeDtypeStruct((batch, CP), jnp.float32),
        grid_spec=grid_spec,
        compiler_params=pltpu.CompilerParams(
            # the branch axis carries the FC accumulator -> must run sequentially.
            dimension_semantics=("arbitrary",)),
    )(ks, x, pk["w1s"], pk["w2s"], pk["bn1s"], pk["bn2s"],
      pk["wfc1s"], pk["bnfc"], pk["wfc2p"], pk["bfc2p"])
    # Lane-dense (batch, 128) store inside the kernel; slice the 4 real classes here.
    return out[:, :NUM_CLASSES]


# ----------------------------- parameters ------------------------------------------
def init_params(key):
    """Deterministic synthetic parameters (shapes follow the PyTorch module), plus
    kernel-ready packed bf16 copies:
      * Conv1d weights (O, I, k) -> per-tap (KMAX, I, CP) slabs (w1s) and tap-major
        packed (KMAX*CP, CP) slabs (w2s); out-channels zero-padded to 128 lanes,
        taps >= k zeroed, stacked over the 4 branches, pre-cast to bf16.
      * gamma/beta packed as (2, C); fc1 weight row-split per branch + zero-padded
        to CP rows; fc2 weight/bias zero-padded to 128 output lanes.
      * Conv biases / first FC bias omitted: they cancel under train-mode BN.
    """
    # TODO(synk): original code loads 'embedding_matrix.pkl'; replaced by random init.
    keys = iter(jax.random.split(key, 16))
    K, E, NB = NUM_KERNELS, EMB_DIM, len(KERNEL_SIZES)
    params = {"embedding": jax.random.normal(next(keys), (VOCAB, E), jnp.float32) * 0.1}

    w1s = np.zeros((NB, KMAX, E, CP), np.float32)
    w2s = np.zeros((NB, KMAX * CP, CP), np.float32)
    bn1s = np.zeros((NB, 2, CP), np.float32)
    bn2s = np.zeros((NB, 2, CP), np.float32)
    convs = []
    for i, ksz in enumerate(KERNEL_SIZES):
        w1_raw = jax.random.normal(next(keys), (K, E, ksz), jnp.float32) * 0.05
        w2_raw = jax.random.normal(next(keys), (K, K, ksz), jnp.float32) * 0.05
        g1 = jnp.ones((K,), jnp.float32)
        bt1 = jnp.zeros((K,), jnp.float32)
        g2 = jnp.ones((K,), jnp.float32)
        bt2 = jnp.zeros((K,), jnp.float32)
        convs.append(dict(w1_raw=w1_raw, w2_raw=w2_raw,
                          g1=g1, bt1=bt1, g2=g2, bt2=bt2))
        w1_t = np.asarray(jnp.transpose(w1_raw, (2, 1, 0)))   # (ksz, E, K)
        w2_t = np.asarray(jnp.transpose(w2_raw, (2, 1, 0)))   # (ksz, K, K)
        w1s[i, :ksz, :, :K] = w1_t
        for d in range(ksz):
            w2s[i, d * CP:d * CP + K, :K] = w2_t[d]
        bn1s[i, 0, :K] = np.asarray(g1)
        bn1s[i, 1, :K] = np.asarray(bt1)
        bn2s[i, 0, :K] = np.asarray(g2)
        bn2s[i, 1, :K] = np.asarray(bt2)
    params["convs"] = convs

    feat = NB * K
    w1_fc = jax.random.normal(next(keys), (feat, HIDDEN), jnp.float32) * 0.05
    g_fc = jnp.ones((HIDDEN,), jnp.float32)
    beta_fc = jnp.zeros((HIDDEN,), jnp.float32)
    w2_fc = jax.random.normal(next(keys), (HIDDEN, NUM_CLASSES), jnp.float32) * 0.05
    b2_fc = jax.random.normal(next(keys), (1, NUM_CLASSES), jnp.float32) * 0.01
    params["fc"] = dict(w1_raw=w1_fc, g_raw=g_fc, beta_raw=beta_fc,
                        w2_raw=w2_fc, b2_raw=b2_fc)

    wfc1s = np.zeros((NB, CP, HIDDEN), np.float32)
    wfc1s[:, :K, :] = np.asarray(w1_fc).reshape(NB, K, HIDDEN)
    wfc2p = np.zeros((HIDDEN, CP), np.float32)
    wfc2p[:, :NUM_CLASSES] = np.asarray(w2_fc)
    bfc2p = np.zeros((1, CP), np.float32)
    bfc2p[:, :NUM_CLASSES] = np.asarray(b2_fc)

    params["packed"] = dict(
        w1s=jnp.asarray(w1s, jnp.bfloat16),
        w2s=jnp.asarray(w2s, jnp.bfloat16),
        bn1s=jnp.asarray(bn1s),
        bn2s=jnp.asarray(bn2s),
        wfc1s=jnp.asarray(wfc1s, jnp.bfloat16),
        bnfc=jnp.stack([g_fc, beta_fc], axis=0),               # (2, HIDDEN) f32
        wfc2p=jnp.asarray(wfc2p, jnp.bfloat16),
        bfc2p=jnp.asarray(bfc2p, jnp.float32),
    )
    return params


# ----------------------------- pure-JAX reference (structural check) ---------------
def textcnn_reference(params, tokens):
    """Mirrors the PyTorch forward (train-mode BN, biased variance); uses the same
    bf16-in / f32-accumulate matmul convention as the kernel."""
    emb = params["embedding"][tokens]                          # (B, L, E)

    def conv1d(xs, w_raw):                                     # xs (B, Lin, Cin)
        k = w_raw.shape[-1]
        lout = xs.shape[1] - k + 1
        taps = jnp.transpose(w_raw, (2, 1, 0))                 # (k, Cin, Cout)
        y = jnp.zeros((xs.shape[0], lout, w_raw.shape[0]), jnp.float32)
        for d in range(k):
            y = y + jnp.dot(xs[:, d:d + lout, :].astype(jnp.bfloat16),
                            taps[d].astype(jnp.bfloat16),
                            preferred_element_type=jnp.float32)
        return y

    def bn_relu(y, g, b, axes):
        mean = jnp.mean(y, axis=axes, keepdims=True)
        var = jnp.mean((y - mean) ** 2, axis=axes, keepdims=True)
        return jnp.maximum((y - mean) * jax.lax.rsqrt(var + BN_EPS) * g + b, 0.0)

    pooled = []
    for p in params["convs"]:
        h1 = bn_relu(conv1d(emb, p["w1_raw"]), p["g1"], p["bt1"], (0, 1))
        h2 = bn_relu(conv1d(h1, p["w2_raw"]), p["g2"], p["bt2"], (0, 1))
        pooled.append(jnp.max(h2, axis=1))                     # (B, K)
    feat = jnp.concatenate(pooled, axis=1)                     # (B, 4K)
    f = params["fc"]
    h = jnp.dot(feat.astype(jnp.bfloat16), f["w1_raw"].astype(jnp.bfloat16),
                preferred_element_type=jnp.float32)
    h = bn_relu(h, f["g_raw"], f["beta_raw"], (0,))
    return jnp.dot(h.astype(jnp.bfloat16), f["w2_raw"].astype(jnp.bfloat16),
                   preferred_element_type=jnp.float32) + f["b2_raw"]


if __name__ == "__main__":
    key = jax.random.PRNGKey(0)
    k_par, k_tok = jax.random.split(key)
    params = init_params(k_par)
    tokens = jax.random.randint(k_tok, (BATCH, MAXLEN), 0, VOCAB, dtype=jnp.int32)

    logits = jax.jit(textcnn_forward)(params, tokens)
    jax.block_until_ready(logits)

    ref = textcnn_reference(params, tokens)
    assert logits.shape == (BATCH, NUM_CLASSES)
    assert bool(jnp.all(jnp.isfinite(logits)))
    assert bool(jnp.allclose(logits, ref, atol=1e-2, rtol=1e-2)), (logits, ref)
    print("KERNEL_OK")
</pallas_src>

<mosaic_0001>
module attributes {stable_mosaic.version = 11 : i64} {
  func.func @_textcnn_kernel(%arg0: i32, %arg1: memref<4xi32, #tpu.memory_space<smem>>, %arg2: memref<80x32xbf16, #tpu.memory_space<vmem>>, %arg3: memref<1x5x32x128xbf16, #tpu.memory_space<vmem>>, %arg4: memref<1x640x128xbf16, #tpu.memory_space<vmem>>, %arg5: memref<1x2x128xf32, #tpu.memory_space<vmem>>, %arg6: memref<1x2x128xf32, #tpu.memory_space<vmem>>, %arg7: memref<1x128x64xbf16, #tpu.memory_space<vmem>>, %arg8: memref<2x64xf32, #tpu.memory_space<vmem>>, %arg9: memref<64x128xbf16, #tpu.memory_space<vmem>>, %arg10: memref<1x128xf32, #tpu.memory_space<vmem>>, %arg11: memref<2x128xf32, #tpu.memory_space<vmem>>, %arg12: memref<2x64xf32, #tpu.memory_space<vmem>>) attributes {dimension_semantics = [#tpu.dimension_semantics<arbitrary>], iteration_bounds = array<i64: 4>, scalar_prefetch = 1 : i64, scratch_operands = 1 : i64, tpu.core_type = #tpu.core_type<tc>, window_params = [{pipeline_mode = #tpu.pipeline_mode<synchronous>, transform_indices = @transform_0, window_bounds = array<i64: 80, 32>}, {transform_indices = @transform_1, window_bounds = array<i64: 1, 5, 32, 128>}, {transform_indices = @transform_2, window_bounds = array<i64: 1, 640, 128>}, {transform_indices = @transform_3, window_bounds = array<i64: 1, 2, 128>}, {transform_indices = @transform_4, window_bounds = array<i64: 1, 2, 128>}, {transform_indices = @transform_5, window_bounds = array<i64: 1, 128, 64>}, {pipeline_mode = #tpu.pipeline_mode<synchronous>, transform_indices = @transform_6, window_bounds = array<i64: 2, 64>}, {pipeline_mode = #tpu.pipeline_mode<synchronous>, transform_indices = @transform_7, window_bounds = array<i64: 64, 128>}, {pipeline_mode = #tpu.pipeline_mode<synchronous>, transform_indices = @transform_8, window_bounds = array<i64: 1, 128>}, {pipeline_mode = #tpu.pipeline_mode<synchronous>, transform_indices = @transform_9, window_bounds = array<i64: 2, 128>}]} {
    %0 = arith.index_cast %arg0 : i32 to index
    %1 = memref.load %arg1[%0] : memref<4xi32, #tpu.memory_space<smem>>
    %c24_i32 = arith.constant 24 : i32
    %2 = arith.subi %c24_i32, %1 : i32
    %c1_i32 = arith.constant 1 : i32
    %3 = arith.addi %2, %c1_i32 : i32
    %c2_i32 = arith.constant 2 : i32
    %4 = arith.muli %c2_i32, %1 : i32
    %c24_i32_0 = arith.constant 24 : i32
    %5 = arith.subi %c24_i32_0, %4 : i32
    %c2_i32_1 = arith.constant 2 : i32
    %6 = arith.addi %5, %c2_i32_1 : i32
    %c0_i32 = arith.constant 0 : i32
    %7 = arith.cmpi eq, %arg0, %c0_i32 : i32
    %8 = arith.extui %7 : i1 to i32
    %c0_i32_2 = arith.constant 0 : i32
    %9 = arith.cmpi ne, %8, %c0_i32_2 : i32
    scf.if %9 {
      %cst_66 = arith.constant 0.000000e+00 : f32
      %173 = vector.broadcast %cst_66 : f32 to vector<2x64xf32>
      %c0_67 = arith.constant 0 : index
      %c0_68 = arith.constant 0 : index
      %174 = vector.load %arg12[%c0_67, %c0_68] : memref<2x64xf32, #tpu.memory_space<vmem>>, vector<2x64xf32>
      tpu.vector_store %arg12[%c0_67, %c0_68], %173 {strides = array<i32>} : memref<2x64xf32, #tpu.memory_space<vmem>>, vector<2x64xf32>,
    } else {
    }
    %10 = tpu.iota {dimensions = array<i32: 0>} : vector<64x1xi32>
    %11 = tpu.iota {dimensions = array<i32: 0>} : vector<48x1xi32>
    %c48_i32 = arith.constant 48 : i32
    %12 = vector.broadcast %c48_i32 : i32 to vector<64x1xi32>
    %13 = arith.cmpi slt, %10, %12 : vector<64x1xi32>
    %c48_i32_3 = arith.constant 48 : i32
    %14 = vector.broadcast %c48_i32_3 : i32 to vector<48x1xi32>
    %15 = arith.cmpi slt, %11, %14 : vector<48x1xi32>
    %c0_i32_4 = arith.constant 0 : i32
    %16 = arith.addi %c0_i32_4, %3 : i32
    %17 = vector.broadcast %16 : i32 to vector<64x1xi32>
    %18 = arith.cmpi slt, %10, %17 : vector<64x1xi32>
    %c24_i32_5 = arith.constant 24 : i32
    %19 = vector.broadcast %c24_i32_5 : i32 to vector<64x1xi32>
    %20 = arith.cmpi sge, %10, %19 : vector<64x1xi32>
    %21 = arith.ori %18, %20 : vector<64x1xi1>
    %22 = arith.andi %13, %21 : vector<64x1xi1>
    %c0_i32_6 = arith.constant 0 : i32
    %23 = arith.addi %c0_i32_6, %6 : i32
    %24 = vector.broadcast %23 : i32 to vector<48x1xi32>
    %25 = arith.cmpi slt, %11, %24 : vector<48x1xi32>
    %c24_i32_7 = arith.constant 24 : i32
    %26 = vector.broadcast %c24_i32_7 : i32 to vector<48x1xi32>
    %27 = arith.cmpi sge, %11, %26 : vector<48x1xi32>
    %28 = arith.ori %25, %27 : vector<48x1xi1>
    %29 = arith.andi %15, %28 : vector<48x1xi1>
    %c24_i32_8 = arith.constant 24 : i32
    %30 = arith.addi %c24_i32_8, %3 : i32
    %31 = vector.broadcast %30 : i32 to vector<64x1xi32>
    %32 = arith.cmpi slt, %10, %31 : vector<64x1xi32>
    %c48_i32_9 = arith.constant 48 : i32
    %33 = vector.broadcast %c48_i32_9 : i32 to vector<64x1xi32>
    %34 = arith.cmpi sge, %10, %33 : vector<64x1xi32>
    %35 = arith.ori %32, %34 : vector<64x1xi1>
    %36 = arith.andi %22, %35 : vector<64x1xi1>
    %c24_i32_10 = arith.constant 24 : i32
    %37 = arith.addi %c24_i32_10, %6 : i32
    %38 = vector.broadcast %37 : i32 to vector<48x1xi32>
    %39 = arith.cmpi slt, %11, %38 : vector<48x1xi32>
    %c48_i32_11 = arith.constant 48 : i32
    %40 = vector.broadcast %c48_i32_11 : i32 to vector<48x1xi32>
    %41 = arith.cmpi sge, %11, %40 : vector<48x1xi32>
    %42 = arith.ori %39, %41 : vector<48x1xi1>
    %43 = arith.andi %29, %42 : vector<48x1xi1>
    %44 = arith.extui %36 : vector<64x1xi1> to vector<64x1xi32>
    %45 = arith.sitofp %44 : vector<64x1xi32> to vector<64x1xf32>
    %46 = arith.extui %43 : vector<48x1xi1> to vector<48x1xi32>
    %47 = arith.sitofp %46 : vector<48x1xi32> to vector<48x1xf32>
    %c0 = arith.constant 0 : index
    %c0_12 = arith.constant 0 : index
    %48 = vector.load %arg2[%c0, %c0_12] : memref<80x32xbf16, #tpu.memory_space<vmem>>, vector<80x32xbf16>
    %49 = arith.extf %48 : vector<80x32xbf16> to vector<80x32xf32>
    %cst = arith.constant 0.000000e+00 : f32
    %50 = vector.broadcast %cst : f32 to vector<64x128xf32>
    %51 = vector.extract_strided_slice %49 {offsets = [0, 0], sizes = [64, 32], strides = [1, 1]} : vector<80x32xf32> to vector<64x32xf32>
    %52 = arith.truncf %51 : vector<64x32xf32> to vector<64x32xbf16>
    %c0_13 = arith.constant 0 : index
    %c0_14 = arith.constant 0 : index
    %c0_15 = arith.constant 0 : index
    %c0_16 = arith.constant 0 : index
    %53 = vector.load %arg3[%c0_13, %c0_14, %c0_15, %c0_16] : memref<1x5x32x128xbf16, #tpu.memory_space<vmem>>, vector<1x1x32x128xbf16>
    %54 = vector.shape_cast %53 : vector<1x1x32x128xbf16> to vector<32x128xbf16>
    %cst_17 = arith.constant dense<0.000000e+00> : vector<64x128xf32>
    %55 = tpu.matmul %52, %54, %cst_17 {dimension_numbers = #tpu.dot_dimension_numbers<[1], [0], [0], [1], [0, 0, 1, 1], [], []>} : vector<64x32xbf16>, vector<32x128xbf16>, vector<64x128xf32> -> vector<64x128xf32>
    %56 = arith.addf %50, %55 : vector<64x128xf32>
    %57 = vector.extract_strided_slice %49 {offsets = [1, 0], sizes = [64, 32], strides = [1, 1]} : vector<80x32xf32> to vector<64x32xf32>
    %58 = arith.truncf %57 : vector<64x32xf32> to vector<64x32xbf16>
    %c0_18 = arith.constant 0 : index
    %c1 = arith.constant 1 : index
    %c0_19 = arith.constant 0 : index
    %c0_20 = arith.constant 0 : index
    %59 = vector.load %arg3[%c0_18, %c1, %c0_19, %c0_20] : memref<1x5x32x128xbf16, #tpu.memory_space<vmem>>, vector<1x1x32x128xbf16>
    %60 = vector.shape_cast %59 : vector<1x1x32x128xbf16> to vector<32x128xbf16>
    %cst_21 = arith.constant dense<0.000000e+00> : vector<64x128xf32>
    %61 = tpu.matmul %58, %60, %cst_21 {dimension_numbers = #tpu.dot_dimension_numbers<[1], [0], [0], [1], [0, 0, 1, 1], [], []>} : vector<64x32xbf16>, vector<32x128xbf16>, vector<64x128xf32> -> vector<64x128xf32>
    %62 = arith.addf %56, %61 : vector<64x128xf32>
    %63 = vector.extract_strided_slice %49 {offsets = [2, 0], sizes = [64, 32], strides = [1, 1]} : vector<80x32xf32> to vector<64x32xf32>
    %64 = arith.truncf %63 : vector<64x32xf32> to vector<64x32xbf16>
    %c0_22 = arith.constant 0 : index
    %c2 = arith.constant 2 : index
    %c0_23 = arith.constant 0 : index
    %c0_24 = arith.constant 0 : index
    %65 = vector.load %arg3[%c0_22, %c2, %c0_23, %c0_24] : memref<1x5x32x128xbf16, #tpu.memory_space<vmem>>, vector<1x1x32x128xbf16>
    %66 = vector.shape_cast %65 : vector<1x1x32x128xbf16> to vector<32x128xbf16>
    %cst_25 = arith.constant dense<0.000000e+00> : vector<64x128xf32>
    %67 = tpu.matmul %64, %66, %cst_25 {dimension_numbers = #tpu.dot_dimension_numbers<[1], [0], [0], [1], [0, 0, 1, 1], [], []>} : vector<64x32xbf16>, vector<32x128xbf16>, vector<64x128xf32> -> vector<64x128xf32>
    %68 = arith.addf %62, %67 : vector<64x128xf32>
    %69 = vector.extract_strided_slice %49 {offsets = [3, 0], sizes = [64, 32], strides = [1, 1]} : vector<80x32xf32> to vector<64x32xf32>
    %70 = arith.truncf %69 : vector<64x32xf32> to vector<64x32xbf16>
    %c0_26 = arith.constant 0 : index
    %c3 = arith.constant 3 : index
    %c0_27 = arith.constant 0 : index
    %c0_28 = arith.constant 0 : index
    %71 = vector.load %arg3[%c0_26, %c3, %c0_27, %c0_28] : memref<1x5x32x128xbf16, #tpu.memory_space<vmem>>, vector<1x1x32x128xbf16>
    %72 = vector.shape_cast %71 : vector<1x1x32x128xbf16> to vector<32x128xbf16>
    %cst_29 = arith.constant dense<0.000000e+00> : vector<64x128xf32>
    %73 = tpu.matmul %70, %72, %cst_29 {dimension_numbers = #tpu.dot_dimension_numbers<[1], [0], [0], [1], [0, 0, 1, 1], [], []>} : vector<64x32xbf16>, vector<32x128xbf16>, vector<64x128xf32> -> vector<64x128xf32>
    %74 = arith.addf %68, %73 : vector<64x128xf32>
    %75 = vector.extract_strided_slice %49 {offsets = [4, 0], sizes = [64, 32], strides = [1, 1]} : vector<80x32xf32> to vector<64x32xf32>
    %76 = arith.truncf %75 : vector<64x32xf32> to vector<64x32xbf16>
    %c0_30 = arith.constant 0 : index
    %c4 = arith.constant 4 : index
    %c0_31 = arith.constant 0 : index
    %c0_32 = arith.constant 0 : index
    %77 = vector.load %arg3[%c0_30, %c4, %c0_31, %c0_32] : memref<1x5x32x128xbf16, #tpu.memory_space<vmem>>, vector<1x1x32x128xbf16>
    %78 = vector.shape_cast %77 : vector<1x1x32x128xbf16> to vector<32x128xbf16>
    %cst_33 = arith.constant dense<0.000000e+00> : vector<64x128xf32>
    %79 = tpu.matmul %76, %78, %cst_33 {dimension_numbers = #tpu.dot_dimension_numbers<[1], [0], [0], [1], [0, 0, 1, 1], [], []>} : vector<64x32xbf16>, vector<32x128xbf16>, vector<64x128xf32> -> vector<64x128xf32>
    %80 = arith.addf %74, %79 : vector<64x128xf32>
    %c0_34 = arith.constant 0 : index
    %c0_35 = arith.constant 0 : index
    %c0_36 = arith.constant 0 : index
    %81 = vector.load %arg5[%c0_34, %c0_35, %c0_36] : memref<1x2x128xf32, #tpu.memory_space<vmem>>, vector<1x2x128xf32>
    %82 = vector.shape_cast %81 : vector<1x2x128xf32> to vector<2x128xf32>
    %c2_i32_37 = arith.constant 2 : i32
    %83 = arith.muli %c2_i32_37, %3 : i32
    %84 = arith.sitofp %83 : i32 to f32
    %cst_38 = arith.constant 1.000000e+00 : f32
    %85 = arith.divf %cst_38, %84 : f32
    %86 = vector.extract_strided_slice %82 {offsets = [0, 0], sizes = [1, 128], strides = [1, 1]} : vector<2x128xf32> to vector<1x128xf32>
    %87 = vector.extract_strided_slice %82 {offsets = [1, 0], sizes = [1, 128], strides = [1, 1]} : vector<2x128xf32> to vector<1x128xf32>
    %88 = vector.broadcast %45 : vector<64x1xf32> to vector<64x128xf32>
    %89 = arith.mulf %80, %88 : vector<64x128xf32>
    %cst_39 = arith.constant dense<0.000000e+00> : vector<128xf32>
    %90 = vector.multi_reduction <add>, %89, %cst_39 [0] : vector<64x128xf32> to vector<128xf32>
    %91 = vector.shape_cast %90 : vector<128xf32> to vector<1x128xf32>
    %92 = vector.broadcast %85 : f32 to vector<1x128xf32>
    %93 = arith.mulf %91, %92 : vector<1x128xf32>
    %94 = arith.mulf %89, %80 : vector<64x128xf32>
    %cst_40 = arith.constant dense<0.000000e+00> : vector<128xf32>
    %95 = vector.multi_reduction <add>, %94, %cst_40 [0] : vector<64x128xf32> to vector<128xf32>
    %96 = vector.shape_cast %95 : vector<128xf32> to vector<1x128xf32>
    %97 = vector.broadcast %85 : f32 to vector<1x128xf32>
    %98 = arith.mulf %96, %97 : vector<1x128xf32>
    %99 = arith.mulf %93, %93 : vector<1x128xf32>
    %100 = arith.subf %98, %99 : vector<1x128xf32>
    %101 = vector.broadcast %93 : vector<1x128xf32> to vector<64x128xf32>
    %102 = arith.subf %80, %101 : vector<64x128xf32>
    %cst_41 = arith.constant 9.99999974E-6 : f32
    %103 = vector.broadcast %cst_41 : f32 to vector<1x128xf32>
    %104 = arith.addf %100, %103 : vector<1x128xf32>
    %105 = math.rsqrt %104 : vector<1x128xf32>
    %106 = vector.broadcast %105 : vector<1x128xf32> to vector<64x128xf32>
    %107 = arith.mulf %102, %106 : vector<64x128xf32>
    %108 = vector.broadcast %86 : vector<1x128xf32> to vector<64x128xf32>
    %109 = arith.mulf %107, %108 : vector<64x128xf32>
    %110 = vector.broadcast %87 : vector<1x128xf32> to vector<64x128xf32>
    %111 = arith.addf %109, %110 : vector<64x128xf32>
    %cst_42 = arith.constant 0.000000e+00 : f32
    %112 = vector.broadcast %cst_42 : f32 to vector<64x128xf32>
    %113 = arith.maximumf %111, %112 : vector<64x128xf32>
    %114 = vector.broadcast %45 : vector<64x1xf32> to vector<64x128xf32>
    %115 = arith.mulf %113, %114 : vector<64x128xf32>
    %116 = vector.extract_strided_slice %115 {offsets = [0, 0], sizes = [48, 128], strides = [1, 1]} : vector<64x128xf32> to vector<48x128xf32>
    %117 = vector.extract_strided_slice %115 {offsets = [1, 0], sizes = [48, 128], strides = [1, 1]} : vector<64x128xf32> to vector<48x128xf32>
    %118 = vector.extract_strided_slice %115 {offsets = [2, 0], sizes = [48, 128], strides = [1, 1]} : vector<64x128xf32> to vector<48x128xf32>
    %119 = vector.extract_strided_slice %115 {offsets = [3, 0], sizes = [48, 128], strides = [1, 1]} : vector<64x128xf32> to vector<48x128xf32>
    %120 = vector.extract_strided_slice %115 {offsets = [4, 0], sizes = [48, 128], strides = [1, 1]} : vector<64x128xf32> to vector<48x128xf32>
    %121 = tpu.concatenate %116, %117, %118, %119, %120 in 1 : vector<48x128xf32>, vector<48x128xf32>, vector<48x128xf32>, vector<48x128xf32>, vector<48x128xf32> -> vector<48x640xf32>
    %122 = arith.truncf %121 : vector<48x640xf32> to vector<48x640xbf16>
    %c0_43 = arith.constant 0 : index
    %c0_44 = arith.constant 0 : index
    %c0_45 = arith.constant 0 : index
    %123 = vector.load %arg4[%c0_43, %c0_44, %c0_45] : memref<1x640x128xbf16, #tpu.memory_space<vmem>>, vector<1x640x128xbf16>
    %124 = vector.shape_cast %123 : vector<1x640x128xbf16> to vector<640x128xbf16>
    %cst_46 = arith.constant dense<0.000000e+00> : vector<48x128xf32>
    %125 = tpu.matmul %122, %124, %cst_46 {dimension_numbers = #tpu.dot_dimension_numbers<[1], [0], [0], [1], [0, 0, 1, 1], [], []>} : vector<48x640xbf16>, vector<640x128xbf16>, vector<48x128xf32> -> vector<48x128xf32>
    %c0_47 = arith.constant 0 : index
    %c0_48 = arith.constant 0 : index
    %c0_49 = arith.constant 0 : index
    %126 = vector.load %arg6[%c0_47, %c0_48, %c0_49] : memref<1x2x128xf32, #tpu.memory_space<vmem>>, vector<1x2x128xf32>
    %127 = vector.shape_cast %126 : vector<1x2x128xf32> to vector<2x128xf32>
    %c2_i32_50 = arith.constant 2 : i32
    %128 = arith.muli %c2_i32_50, %6 : i32
    %129 = arith.sitofp %128 : i32 to f32
    %cst_51 = arith.constant 1.000000e+00 : f32
    %130 = arith.divf %cst_51, %129 : f32
    %131 = vector.extract_strided_slice %127 {offsets = [0, 0], sizes = [1, 128], strides = [1, 1]} : vector<2x128xf32> to vector<1x128xf32>
    %132 = vector.extract_strided_slice %127 {offsets = [1, 0], sizes = [1, 128], strides = [1, 1]} : vector<2x128xf32> to vector<1x128xf32>
    %133 = vector.broadcast %47 : vector<48x1xf32> to vector<48x128xf32>
    %134 = arith.mulf %125, %133 : vector<48x128xf32>
    %cst_52 = arith.constant dense<0.000000e+00> : vector<128xf32>
    %135 = vector.multi_reduction <add>, %134, %cst_52 [0] : vector<48x128xf32> to vector<128xf32>
    %136 = vector.shape_cast %135 : vector<128xf32> to vector<1x128xf32>
    %137 = vector.broadcast %130 : f32 to vector<1x128xf32>
    %138 = arith.mulf %136, %137 : vector<1x128xf32>
    %139 = arith.mulf %134, %125 : vector<48x128xf32>
    %cst_53 = arith.constant dense<0.000000e+00> : vector<128xf32>
    %140 = vector.multi_reduction <add>, %139, %cst_53 [0] : vector<48x128xf32> to vector<128xf32>
    %141 = vector.shape_cast %140 : vector<128xf32> to vector<1x128xf32>
    %142 = vector.broadcast %130 : f32 to vector<1x128xf32>
    %143 = arith.mulf %141, %142 : vector<1x128xf32>
    %144 = arith.mulf %138, %138 : vector<1x128xf32>
    %145 = arith.subf %143, %144 : vector<1x128xf32>
    %146 = vector.broadcast %138 : vector<1x128xf32> to vector<48x128xf32>
    %147 = arith.subf %125, %146 : vector<48x128xf32>
    %cst_54 = arith.constant 9.99999974E-6 : f32
    %148 = vector.broadcast %cst_54 : f32 to vector<1x128xf32>
    %149 = arith.addf %145, %148 : vector<1x128xf32>
    %150 = math.rsqrt %149 : vector<1x128xf32>
    %151 = vector.broadcast %150 : vector<1x128xf32> to vector<48x128xf32>
    %152 = arith.mulf %147, %151 : vector<48x128xf32>
    %153 = vector.broadcast %131 : vector<1x128xf32> to vector<48x128xf32>
    %154 = arith.mulf %152, %153 : vector<48x128xf32>
    %155 = vector.broadcast %132 : vector<1x128xf32> to vector<48x128xf32>
    %156 = arith.addf %154, %155 : vector<48x128xf32>
    %cst_55 = arith.constant 0.000000e+00 : f32
    %157 = vector.broadcast %cst_55 : f32 to vector<48x128xf32>
    %158 = arith.maximumf %156, %157 : vector<48x128xf32>
    %159 = vector.broadcast %47 : vector<48x1xf32> to vector<48x128xf32>
    %160 = arith.mulf %158, %159 : vector<48x128xf32>
    %161 = vector.shape_cast %160 : vector<48x128xf32> to vector<2x24x128xf32>
    %cst_56 = arith.constant dense<0xFF800000> : vector<2x128xf32>
    %162 = vector.multi_reduction <maximumf>, %161, %cst_56 [1] : vector<2x24x128xf32> to vector<2x128xf32>
    %c0_57 = arith.constant 0 : index
    %c0_58 = arith.constant 0 : index
    %163 = vector.load %arg12[%c0_57, %c0_58] : memref<2x64xf32, #tpu.memory_space<vmem>>, vector<2x64xf32>
    %164 = arith.truncf %162 : vector<2x128xf32> to vector<2x128xbf16>
    %c0_59 = arith.constant 0 : index
    %c0_60 = arith.constant 0 : index
    %c0_61 = arith.constant 0 : index
    %165 = vector.load %arg7[%c0_59, %c0_60, %c0_61] : memref<1x128x64xbf16, #tpu.memory_space<vmem>>, vector<1x128x64xbf16>
    %166 = vector.shape_cast %165 : vector<1x128x64xbf16> to vector<128x64xbf16>
    %cst_62 = arith.constant dense<0.000000e+00> : vector<2x64xf32>
    %167 = tpu.matmul %164, %166, %cst_62 {dimension_numbers = #tpu.dot_dimension_numbers<[1], [0], [0], [1], [0, 0, 1, 1], [], []>} : vector<2x128xbf16>, vector<128x64xbf16>, vector<2x64xf32> -> vector<2x64xf32>
    %168 = arith.addf %163, %167 : vector<2x64xf32>
    %c0_63 = arith.constant 0 : index
    %c0_64 = arith.constant 0 : index
    %169 = vector.load %arg12[%c0_63, %c0_64] : memref<2x64xf32, #tpu.memory_space<vmem>>, vector<2x64xf32>
    tpu.vector_store %arg12[%c0_63, %c0_64], %168 {strides = array<i32>} : memref<2x64xf32, #tpu.memory_space<vmem>>, vector<2x64xf32>,
    %c3_i32 = arith.constant 3 : i32
    %170 = arith.cmpi eq, %arg0, %c3_i32 : i32
    %171 = arith.extui %170 : i1 to i32
    %c0_i32_65 = arith.constant 0 : i32
    %172 = arith.cmpi ne, %171, %c0_i32_65 : i32
    scf.if %172 {
      %c0_66 = arith.constant 0 : index
      %c0_67 = arith.constant 0 : index
      %173 = vector.load %arg12[%c0_66, %c0_67] : memref<2x64xf32, #tpu.memory_space<vmem>>, vector<2x64xf32>
      %c0_68 = arith.constant 0 : index
      %c0_69 = arith.constant 0 : index
      %174 = vector.load %arg8[%c0_68, %c0_69] : memref<2x64xf32, #tpu.memory_space<vmem>>, vector<2x64xf32>
      %175 = vector.extract_strided_slice %174 {offsets = [0, 0], sizes = [1, 64], strides = [1, 1]} : vector<2x64xf32> to vector<1x64xf32>
      %176 = vector.extract_strided_slice %174 {offsets = [1, 0], sizes = [1, 64], strides = [1, 1]} : vector<2x64xf32> to vector<1x64xf32>
      %cst_70 = arith.constant dense<0.000000e+00> : vector<64xf32>
      %177 = vector.multi_reduction <add>, %173, %cst_70 [0] : vector<2x64xf32> to vector<64xf32>
      %178 = vector.shape_cast %177 : vector<64xf32> to vector<1x64xf32>
      %cst_71 = arith.constant 5.000000e-01 : f32
      %179 = vector.broadcast %cst_71 : f32 to vector<1x64xf32>
      %180 = arith.mulf %178, %179 : vector<1x64xf32>
      %181 = arith.mulf %173, %173 : vector<2x64xf32>
      %cst_72 = arith.constant dense<0.000000e+00> : vector<64xf32>
      %182 = vector.multi_reduction <add>, %181, %cst_72 [0] : vector<2x64xf32> to vector<64xf32>
      %183 = vector.shape_cast %182 : vector<64xf32> to vector<1x64xf32>
      %cst_73 = arith.constant 5.000000e-01 : f32
      %184 = vector.broadcast %cst_73 : f32 to vector<1x64xf32>
      %185 = arith.mulf %183, %184 : vector<1x64xf32>
      %186 = arith.mulf %180, %180 : vector<1x64xf32>
      %187 = arith.subf %185, %186 : vector<1x64xf32>
      %188 = vector.broadcast %180 : vector<1x64xf32> to vector<2x64xf32>
      %189 = arith.subf %173, %188 : vector<2x64xf32>
      %cst_74 = arith.constant 9.99999974E-6 : f32
      %190 = vector.broadcast %cst_74 : f32 to vector<1x64xf32>
      %191 = arith.addf %187, %190 : vector<1x64xf32>
      %192 = math.rsqrt %191 : vector<1x64xf32>
      %193 = vector.broadcast %192 : vector<1x64xf32> to vector<2x64xf32>
      %194 = arith.mulf %189, %193 : vector<2x64xf32>
      %195 = vector.broadcast %175 : vector<1x64xf32> to vector<2x64xf32>
      %196 = arith.mulf %194, %195 : vector<2x64xf32>
      %197 = vector.broadcast %176 : vector<1x64xf32> to vector<2x64xf32>
      %198 = arith.addf %196, %197 : vector<2x64xf32>
      %cst_75 = arith.constant 0.000000e+00 : f32
      %199 = vector.broadcast %cst_75 : f32 to vector<2x64xf32>
      %200 = arith.maximumf %198, %199 : vector<2x64xf32>
      %201 = arith.truncf %200 : vector<2x64xf32> to vector<2x64xbf16>
      %c0_76 = arith.constant 0 : index
      %c0_77 = arith.constant 0 : index
      %202 = vector.load %arg9[%c0_76, %c0_77] : memref<64x128xbf16, #tpu.memory_space<vmem>>, vector<64x128xbf16>
      %cst_78 = arith.constant dense<0.000000e+00> : vector<2x128xf32>
      %203 = tpu.matmul %201, %202, %cst_78 {dimension_numbers = #tpu.dot_dimension_numbers<[1], [0], [0], [1], [0, 0, 1, 1], [], []>} : vector<2x64xbf16>, vector<64x128xbf16>, vector<2x128xf32> -> vector<2x128xf32>
      %c0_79 = arith.constant 0 : index
      %c0_80 = arith.constant 0 : index
      %204 = vector.load %arg10[%c0_79, %c0_80] : memref<1x128xf32, #tpu.memory_space<vmem>>, vector<1x128xf32>
      %205 = vector.broadcast %204 : vector<1x128xf32> to vector<2x128xf32>
      %206 = arith.addf %203, %205 : vector<2x128xf32>
      %c0_81 = arith.constant 0 : index
      %c0_82 = arith.constant 0 : index
      %207 = vector.load %arg11[%c0_81, %c0_82] : memref<2x128xf32, #tpu.memory_space<vmem>>, vector<2x128xf32>
      tpu.vector_store %arg11[%c0_81, %c0_82], %206 {strides = array<i32>} : memref<2x128xf32, #tpu.memory_space<vmem>>, vector<2x128xf32>,
    } else {
    }
    return
  }
  func.func @transform_0(%arg0: i32, %arg1: memref<4xi32, #tpu.memory_space<smem>>) -> (i32, i32) {
    %c0_i32 = arith.constant 0 : i32
    %c0_i32_0 = arith.constant 0 : i32
    %c0_i32_1 = arith.constant 0 : i32
    return %c0_i32, %c0_i32_0 : i32, i32
  }
  func.func @transform_1(%arg0: i32, %arg1: memref<4xi32, #tpu.memory_space<smem>>) -> (i32, i32, i32, i32) {
    %c0_i32 = arith.constant 0 : i32
    %c0_i32_0 = arith.constant 0 : i32
    %c0_i32_1 = arith.constant 0 : i32
    %c0_i32_2 = arith.constant 0 : i32
    return %arg0, %c0_i32, %c0_i32_0, %c0_i32_1 : i32, i32, i32, i32
  }
  func.func @transform_2(%arg0: i32, %arg1: memref<4xi32, #tpu.memory_space<smem>>) -> (i32, i32, i32) {
    %c0_i32 = arith.constant 0 : i32
    %c0_i32_0 = arith.constant 0 : i32
    %c0_i32_1 = arith.constant 0 : i32
    return %arg0, %c0_i32, %c0_i32_0 : i32, i32, i32
  }
  func.func @transform_3(%arg0: i32, %arg1: memref<4xi32, #tpu.memory_space<smem>>) -> (i32, i32, i32) {
    %c0_i32 = arith.constant 0 : i32
    %c0_i32_0 = arith.constant 0 : i32
    %c0_i32_1 = arith.constant 0 : i32
    return %arg0, %c0_i32, %c0_i32_0 : i32, i32, i32
  }
  func.func @transform_4(%arg0: i32, %arg1: memref<4xi32, #tpu.memory_space<smem>>) -> (i32, i32, i32) {
    %c0_i32 = arith.constant 0 : i32
    %c0_i32_0 = arith.constant 0 : i32
    %c0_i32_1 = arith.constant 0 : i32
    return %arg0, %c0_i32, %c0_i32_0 : i32, i32, i32
  }
  func.func @transform_5(%arg0: i32, %arg1: memref<4xi32, #tpu.memory_space<smem>>) -> (i32, i32, i32) {
    %c0_i32 = arith.constant 0 : i32
    %c0_i32_0 = arith.constant 0 : i32
    %c0_i32_1 = arith.constant 0 : i32
    return %arg0, %c0_i32, %c0_i32_0 : i32, i32, i32
  }
  func.func @transform_6(%arg0: i32, %arg1: memref<4xi32, #tpu.memory_space<smem>>) -> (i32, i32) {
    %c0_i32 = arith.constant 0 : i32
    %c0_i32_0 = arith.constant 0 : i32
    %c0_i32_1 = arith.constant 0 : i32
    return %c0_i32, %c0_i32_0 : i32, i32
  }
  func.func @transform_7(%arg0: i32, %arg1: memref<4xi32, #tpu.memory_space<smem>>) -> (i32, i32) {
    %c0_i32 = arith.constant 0 : i32
    %c0_i32_0 = arith.constant 0 : i32
    %c0_i32_1 = arith.constant 0 : i32
    return %c0_i32, %c0_i32_0 : i32, i32
  }
  func.func @transform_8(%arg0: i32, %arg1: memref<4xi32, #tpu.memory_space<smem>>) -> (i32, i32) {
    %c0_i32 = arith.constant 0 : i32
    %c0_i32_0 = arith.constant 0 : i32
    %c0_i32_1 = arith.constant 0 : i32
    return %c0_i32, %c0_i32_0 : i32, i32
  }
  func.func @transform_9(%arg0: i32, %arg1: memref<4xi32, #tpu.memory_space<smem>>) -> (i32, i32) {
    %c0_i32 = arith.constant 0 : i32
    %c0_i32_0 = arith.constant 0 : i32
    %c0_i32_1 = arith.constant 0 : i32
    return %c0_i32, %c0_i32_0 : i32, i32
  }
}

</mosaic_0001>

<bundles_post_ra>
// kernel: textcnn_forward.1
= control target key start
LH: loop header
LB: loop body
LE: loop exit
PB: predicated region body
PF: predicated region fallthrough
CT: control target
= control target key end

     0   :  { %s3615_s0 = inlined_call_operand.vmem [shape: s32[4], index: 0, kind: input, shape index: {}]   ;;  %s3616_s1 = inlined_call_operand.vmem [shape: bf16[80,32], index: 1, kind: input, shape index: {}]   ;;  %s3617_s2 = inlined_call_operand.vmem [shape: bf16[4,5,32,128], index: 2, kind: input, shape index: {}]   ;;  %s3618_s3 = inlined_call_operand.hbm [shape: bf16[4,640,128], index: 3, kind: input, shape index: {}]   ;;  %s3619_s4 = inlined_call_operand.vmem [shape: f32[4,2,128], index: 4, kind: input, shape index: {}]   ;;  %s3620_s5 = inlined_call_operand.vmem [shape: f32[4,2,128], index: 5, kind: input, shape index: {}]   ;;  %s3621_s6 = inlined_call_operand.vmem [shape: bf16[4,128,64], index: 6, kind: input, shape index: {}]   ;;  %s3622_s7 = inlined_call_operand.vmem [shape: f32[2,64], index: 7, kind: input, shape index: {}]   ;;  %s3623_s8 = inlined_call_operand.vmem [shape: bf16[64,128], index: 8, kind: input, shape index: {}]   ;;  %s3624_s9 = inlined_call_operand.vmem [shape: f32[1,128], index: 9, kind: input, shape index: {}]   ;;  %s3625_s10 = inlined_call_operand.hbm [shape: f32[2,128], index: 10, kind: output, shape index: {}]  }
   0x1   :  { %3628 = sst [smem:[#allocation14_spill]] %s3618_s3  ;;  %s15_s15 = sshll.u32 %s3615_s0, 4  ;;  %s16_s15 = int_to_ptr.vmem [resolvable:$true] %s15_s15 }
   0x2   :  { %s2851_s16 = scalar_lea.vmem %s16_s15, 16  ;;  %p2856_p1 = scmp.lt.s32.totalorder %s16_s15, %s16_s15 }
   0x3   :  { %p2852_p0 = scmp.ne.s32.totalorder %s16_s15, %s2851_s16  ;;  %p2857_p2 = scmp.lt.s32.totalorder %s2851_s16, %s2851_s16 }
   0x5   :  { %p2858_p3 = por %p2857_p2, %p2856_p1 }
   0x7   :  { %p2859_p4 = pnand %p2858_p3, %p2852_p0 }
   0x9   :  { %2862 = shalt.err (!%p2859_p4)  }
   0xa   :  { %s2957_s17 = smov [#allocation4]  }
   0xb   :  { %18 = dma.vmem_to_smem %s16_s15, 16, %s2957_s17, [#allocation3] }
   0xc   :  { %2931 = dma.done.wait [#allocation3], 16 }
   0xd   :  { %2932 = vsyncadd [#allocation3], 4294967280 }
   0xe   :  { %20 = sfence }
   0xf   :  { %21 = vsyncpa [#allocation6], 0 }
  0x10   :  { %23 = vsyncpa [#allocation6 + $0x1], 0 }
  0x11   :  { %24 = vsyncpa [#allocation7], 0  ;;  %s3025_s18 = smov 0   ;;  %s3027_s19 = smov 0  }
  0x12   :  { %s3029_s0 = smov 0   ;;  %s3031_s20 = smov 0  }
  0x13 LB: > { %3629 = sst [smem:[#allocation12_spill]] %s2951_s0  ;;  %s3044_s21 = sadd.s32 4294967295, %s2955_s20   ;;  %s2955_s20 = sphi %s3031_s20, %s3640_s20   ;;  %s2951_s0 = sphi %s3029_s0, %s3637_s0   ;;  %s2947_s19 = sphi %s3027_s19, %s3639_s19   ;;  %s2943_s18 = sphi %s3025_s18, %s3638_s18  }
  0x14   : > { %s3047_s22 = sadd.s32 1, %s2955_s20   ;;  %s84_s24 = sadd.s32 1, %s2951_s0 }
  0x15   : > { %s81_s23 = ssub.s32 %s2955_s20, %s3047_s22  ;;  %p91_p6 = scmp.ne.s32.totalorder %s2951_s0, %s2947_s19 }
  0x16   : > { %p82_p5 = scmp.eq.s32.totalorder %s81_s23, 0  ;;  %p92_p7 = scmp.eq.s32.totalorder %s2955_s20, 0 }
  0x17   : > { %p97_p8 = scmp.ne.s32.totalorder %s2947_s19, %s2943_s18  ;;  %p98_p10 = scmp.eq.s32.totalorder %s3044_s21, 0 }
  0x18   : > { %s3057_s25 = scalar_select %p82_p5, %s2951_s0, %s84_s24  }
  0x19   : > { %p93_p9 = por %p92_p7, %p91_p6  ;;  %p2730_p11 = scmp.lt.s32.totalorder %s2955_s20, 4 }
  0x1a   : > { %3630 = sst [smem:[#allocation13_spill]] %s3057_s25  ;;  %p3061_p12 = por %p98_p10, %p97_p8 }
  0x1b   : > { %s303_s27 = sand.u32 1, %s2951_s0   ;;  %s2713_s29 = smul.u32 5120, %s2955_s20 }
  0x1c   : > { %s3631_s26 = scalar_select %p3061_p12, 1, 0 }
  0x1d   : > { %s2712_s28 = smul.u32 320, %s303_s27  ;;  %p3067_p13 = pnand %p2730_p11, %p93_p9 }
  0x1e   : > { %s3633_s3 = sld [smem:[#allocation14_spill]]  ;;  %s3079_s16 = scalar_lea.sflag [#allocation6], %s303_s27 }
  0x1f   : > { %s307_s14 = scalar_lea.vmem [#allocation5], %s2712_s28  ;;  %p2865_p2 = pneg %p3067_p13 }
  0x20   : > { %s314_s15 = sshll.u32 %s307_s14, 4  ;;  %s3076_s15 = int_to_ptr.vmem [resolvable:$true] %s314_s15 }
  0x24   : > { %s3074_s13 = scalar_lea.hbm %s3633_s3, %s2713_s29  ;;  %s2868_s24 = scalar_lea.hbm %s3633_s3, 20480 }
  0x25   : > { %s2863_s17 = scalar_lea.hbm %s3074_s13, 5120  ;;  %p2869_p5 = scmp.lt.s32.totalorder %s3074_s13, %s3633_s3 }
  0x26   : > { %p2864_p1 = scmp.ne.s32.totalorder %s3074_s13, %s2863_s17  ;;  %p2870_p6 = scmp.lt.s32.totalorder %s2868_s24, %s2863_s17 }
  0x28   : > { %p2866_p3 = pnand %p2865_p2, %p2864_p1  ;;  %p2871_p7 = por %p2870_p6, %p2869_p5 }
  0x2a   : > { %p2867_p4 = pneg %p2866_p3 }
  0x2c   : > { %p2872_p8 = pnand %p2871_p7, %p2867_p4 }
  0x2e   : > { %2875 = shalt.err (!%p2872_p8)
}
  0x2f   : > { %s2876_s27 = scalar_lea.vmem %s3076_s15, 5120  ;;  %s2958_s28 = smov [#allocation5]  }
  0x30   : > { %p2877_p9 = scmp.ne.s32.totalorder %s3076_s15, %s2876_s27  ;;  %s2881_s12 = sshll.u32 %s2958_s28, 4  ;;  %s2882_s12 = int_to_ptr.vmem [resolvable:$false] %s2881_s12 }
  0x31   : > { %s2883_s14 = scalar_lea.vmem %s2882_s12, 10240  ;;  %p2884_p1 = scmp.lt.s32.totalorder %s3076_s15, %s2882_s12 }
  0x32   : > { %p2879_p10 = pnand %p2877_p9, %p2865_p2  ;;  %p2885_p3 = scmp.lt.s32.totalorder %s2883_s14, %s2876_s27 }
  0x34   : > { %p2880_p11 = pneg %p2879_p10  ;;  %p2886_p0 = por %p2885_p3, %p2884_p1 }
  0x36   : > { %p2887_p12 = pnand %p2886_p0, %p2880_p11 }
  0x38   : > { %2890 = shalt.err (!%p2887_p12)
}
  0x39   : > { %s2959_s17 = smov 64   ;;  %s2960_s18 = smov 4  }
  0x3a   : > { %2729 = dma.hbm_to_vmem [thread:$0]  (!%p3067_p13), %s3074_s13, 5120, %s3076_s15, %s3079_s16, %s2959_s17, %s2959_s17, %s2960_s18  }
  0x3b   : > { %p344_p2 = scmp.lt.s32.totalorder %s2955_s20, 5  ;;  %p3634_p4 = scmp.ge.s32.totalorder %s2955_s20, 1 }
  0x3d   : > { %p345_p5 = pnand %p3634_p4, %p344_p2 }
  0x3e   : > { %s350_s23 = sand.u32 (!%p345_p5), 1, %s2947_s19   ;;  %p3635_p12 = scmp.ne.s32.totalorder (!%p345_p5), %s3631_s26, 0 }
  0x3f   : > { %348 = sbr.rel (%p345_p5) target bundleno = 1176 (0x498), region = 56  ;;  %s351_s29 = scalar_lea.sflag (!%p345_p5), [#allocation6], %s350_s23 }
  0x40   : > { %s2714_s24 = smul.u32 (!%p345_p5), 320, %s350_s23 }
  0x42   : > { %s3104_s11 = scalar_lea.vmem (!%p345_p5), [#allocation5], %s2714_s24 }
  0x44   : > { %2934 = dma.done.wait (%p3635_p12), %s351_s29, 5120  }
  0x45   : > { %2936 = vsyncadd (%p3635_p12), %s351_s29, 4294962176  ;;  %p402_p13 = scmp.lt.s32.totalorder %s3044_s21, 3  ;;  %s3112_s30 = sld [smem:[#allocation4 + %s3044_s21]] }
  0x46   : > { %p2343_p0 = scmp.ne.s32.totalorder %s3044_s21, 0 }
  0x47   : > { %s403_s20 = scalar_select %p402_p13, %s3044_s21, 3 }
  0x49   : > { %s2715_s13 = smul.u32 80, %s403_s20  ;;  %s2338_s15 = sshll.u32 %s403_s20, 1 }
  0x4a   : > { %s3118_s28 = scalar_lea.vmem %s3619_s4, %s2338_s15  ;;  %s3123_s14 = scalar_lea.vmem %s3620_s5, %s2338_s15 }
  0x4b   : > { %s3128_s23 = scalar_lea.vmem %s3617_s2, %s2715_s13  ;;  %s2468_s24 = sshll.u32 %s403_s20, 6 }
  0x4c   : > { %s422_s29 = ssub.s32 25, %s3112_s30  ;;  %s2342_s3 = sshll.u32 %s3112_s30, 1 }
  0x4d   : > { %s3134_s25 = ssub.s32 26, %s2342_s3  ;;  %s3139_s27 = scalar_lea.vmem %s3621_s6, %s2468_s24 }
  0x4e   : > { %428 = sbr.rel (%p2343_p0) target bundleno = 85 (0x55), region = 64 }
  0x53   : > { %vm429_vm0 = vcmask 517120   ;;  %v2961_v0 = vmov 0.0  }
  0x54   : > { %430 = vst.msk [vmem:[#allocation2] sm:$0x3] %vm429_vm0, %v2961_v0 }
  0x55 PF: > { %v2774_v1 = vld [vmem:[%s3128_s23 + $0x18] sm:$0xff]   ;;  %v2775_v2 = vld [vmem:[%s3128_s23 + $0x8] sm:$0xff]   ;;  %v2776_v3 = vld [vmem:[%s3128_s23 + $0x10] sm:$0xff]   ;;  %vm663_vm1 = vcmask 261120   ;;  %vm614_vm2 = vsmask.f32 7424 }
  0x56   : > { %2592 = vmatprep.subr.bf16.mxu0 %v2774_v1  ;;  %2604 = vmatprep.subr.bf16.mxu1 %v2775_v2  ;;  %v2777_v4 = vld [vmem:[%s3128_s23] sm:$0xff]   ;;  %v3154_v6 = vld [vmem:[%s3616_s1 + $0x8] sm:$0xff]   ;;  %v3159_v7 = vld [vmem:[%s3616_s1 + $0x10] sm:$0xff]   ;;  %vm836_vm3 = vcmask 1046528   ;;  %vm948_vm4 = vsmask.f32 6400 }
  0x57   : > { %2593 = vmatpush3.bf16.msra.mxu0 %v2774_v1  ;;  %2605 = vmatpush3.bf16.msra.mxu1 %v2775_v2  ;;  %v3149_v5 = vld [vmem:[%s3616_s1] sm:$0xff]   ;;  %v623_v10 = vshll.u32 %v3154_v6, 16  ;;  %v627_v11 = vshrl.u32 %v3154_v6, 16  ;;  %v631_v12 = vshll.u32 %v3159_v7, 16  ;;  %v2781_v13 = vld [vmem:[%s3128_s23 + $0x28] sm:$0xff]   ;;  %v3172_v17 = vld [vmem:[%s3616_s1 + $0x18] sm:$0xff]  }
  0x58   : > { %2594 = vmatprep.subr.bf16.mxu0 %v2776_v3  ;;  %2606 = vmatprep.subr.bf16.mxu1 %v2777_v4  ;;  %v616_v8 = vshrl.u32 %v3149_v5, 16  ;;  %v618_v9 = vshll.u32 %v3149_v5, 16  ;;  %v635_v18 = vshrl.u32 %v3159_v7, 16  ;;  %v3180_v21 = vld [vmem:[%s3616_s1 + $0x20] ss:$0 sps:$4 sm:$0xff]   ;;  %v639_v24 = vshll.u32 %v3172_v17, 16 }
  0x59   : > { %2608 = vmatprep.mubr.msk.bf16.mxu1 %vm663_vm1, %v3149_v5  ;;  %v625_v15 = vrot.slane %v623_v10, 1  ;;  %v633_v16 = vrot.slane %v631_v12, 1  ;;  %v643_v25 = vshrl.u32 %v3172_v17, 16  ;;  %v2784_v26 = vld [vmem:[%s3128_s23 + $0x20] sm:$0xff]   ;;  %v647_v29 = vshll.u32 %v3180_v21, 16  ;;  %v2785_v30 = vld [vmem:[%s3128_s23 + $0x38] sm:$0xff]  }
  0x5a   : > { %v620_v14 = vrot.slane %v618_v9, 1  ;;  %v949_v22 = vrot.slane %v616_v8, 1  ;;  %v957_v31 = vrot.slane %v631_v12, 2  ;;  %v641_v32 = vrot.slane %v639_v24, 1  ;;  %v2786_v34 = vld [vmem:[%s3128_s23 + $0x30] sm:$0xff]   ;;  %v2787_v42 = vld [vmem:[%s3128_s23 + $0x48] sm:$0xff]  }
  0x5b   : > { %2595 = vmatpush3.bf16.msra.mxu0 %v2776_v3  ;;  %2607 = vmatpush3.bf16.msra.mxu1 %v2777_v4  ;;  %v629_v20 = vor.u32 %v627_v11, %v625_v15  ;;  %v637_v23 = vor.u32 %v635_v18, %v633_v16  ;;  %v956_v33 = vrot.slane %v635_v18, 1  ;;  %v953_v35 = vrot.slane %v623_v10, 2  ;;  %v2788_v2 = vld [vmem:[%s3128_s23 + $0x40] sm:$0xff]   ;;  %s2407_s23 = sshll.u32 %s422_s29, 1  ;;  %v2793_v18 = vld [vmem:[%s3104_s11 + $0x70] sm:$0xff]   ;;  %s500_s20 = ssub.s32 49, %s3112_s30 }
  0x5c   : > { %2616 = vmatprep.subr.bf16.mxu0 %v2781_v13  ;;  %v621_v19 = vor.u32 %v620_v14, %v616_v8  ;;  %2628 = vmatprep.subr.bf16.mxu1 %v2785_v30  ;;  %v837_v36 = vrot.slane %v3149_v5, 1  ;;  %v645_v38 = vor.u32 %v643_v25, %v641_v32  ;;  %v649_v39 = vrot.slane %v647_v29, 1  ;;  %s1181_s0 = scvt.s32.f32 %s2407_s23  ;;  %v2789_v14 = vld [vmem:[%s3104_s11 + $0x78] sm:$0xff]   ;;  %p2457_p6 = scmp.ne.s32.totalorder %s3044_s21, 3 }
  0x5d   : > { %v634_v28 = vsel %vm614_vm2, %v629_v20, %v633_v16  ;;  %v642_v37 = vsel %vm614_vm2, %v637_v23, %v641_v32  ;;  %v838_v40 = vrot.slane %v3154_v6, 1  ;;  %v840_v41 = vrot.slane %v3159_v7, 1  ;;  %v2791_v16 = vld [vmem:[%s3104_s11 + $0xf8] sm:$0xff]   ;;  %v2795_v20 = vld [vmem:[%s3104_s11 + $0xf0] sm:$0xff]   ;;  %v2799_v23 = vld [vmem:[%s3104_s11 + $0xe8] sm:$0xff]  }
  0x5e   : > { %2609 = vmatmul.mubr.msk.bf16.vlgmr.msra.gmra.mxu1 %vm663_vm1, %v3154_v6  ;;  %v626_v27 = vsel %vm614_vm2, %v621_v19, %v625_v15  ;;  %v950_v43 = vrot.slane %v618_v9, 2  ;;  %v952_v44 = vrot.slane %v627_v11, 1  ;;  %v958_v45 = vor.u32 %v957_v31, %v956_v33  ;;  %v2790_v15 = vld [vmem:[%s3104_s11 + $0x38] sm:$0xff]   ;;  %v2794_v19 = vld [vmem:[%s3104_s11 + $0x30] sm:$0xff]  }
  0x5f   : > { %2612 = vmatprep.mubr.msk.bf16.mxu1 %vm663_vm1, %v3159_v7  ;;  %2596 = vmatprep.mubr.msk.bf16.mxu0 %vm663_vm1, %v626_v27  ;;  %v960_v46 = vrot.slane %v643_v25, 1  ;;  %v961_v47 = vrot.slane %v639_v24, 2  ;;  %v842_v50 = vrot.slane %v3172_v17, 1  ;;  %v964_v51 = vshrl.u32 %v3180_v21, 16  ;;  %v2798_v24 = vld [vmem:[%s3104_s11 + $0x28] sm:$0xff]   ;;  %v2803_v27 = vld [vmem:[%s3104_s11 + $0xe0] sm:$0xff]  }
  0x60   : > { %2597 = vmatmul.mubr.msk.bf16.vlgmr.msra.gmra.mxu0 %vm663_vm1, %v634_v28  ;;  %2629 = vmatpush3.bf16.msra.mxu1 %v2785_v30  ;;  %v951_v48 = vor.u32 %v950_v43, %v949_v22  ;;  %v954_v49 = vor.u32 %v953_v35, %v952_v44  ;;  %v650_v52 = vsel %vm614_vm2, %v645_v38, %v649_v39  ;;  %v844_v54 = vrot.slane %v3180_v21, 1  ;;  %v2797_v22 = vld [vmem:[%s3104_s11 + $0x68] sm:$0xff]   ;;  %v2802_v28 = vld [vmem:[%s3104_s11 + $0x20] sm:$0xff]   ;;  %v2805_v30 = vld [vmem:[%s3104_s11 + $0x58] sm:$0xff]  }
  0x61   : > { %2617 = vmatpush3.bf16.msra.mxu0 %v2781_v13  ;;  %2600 = vmatprep.mubr.msk.bf16.mxu0 %vm663_vm1, %v642_v37  ;;  %v839_v53 = vsel %vm836_vm3, %v837_v36, %v838_v40  ;;  %v967_v55 = vrot.slane %v647_v29, 2  ;;  %v962_v57 = vor.u32 %v961_v47, %v960_v46  ;;  %v966_v58 = vrot.slane %v964_v51, 1  ;;  %v2800_v25 = vld [vmem:[%s3104_s11 + $0xa8] sm:$0xff]   ;;  %v2804_v29 = vld [vmem:[%s3104_s11 + $0xa0] sm:$0xff]   ;;  %v2807_v31 = vld [vmem:[%s3104_s11 + $0xd8] sm:$0xff]  }
  0x62   : > { %2618 = vmatprep.subr.bf16.mxu0 %v2784_v26  ;;  %2630 = vmatprep.subr.bf16.mxu1 %v2786_v34  ;;  %v955_v56 = vsel %vm948_vm4, %v951_v48, %v954_v49  ;;  %v1073_v59 = vrot.slane %v3149_v5, 2  ;;  %v1074_v60 = vrot.slane %v3154_v6, 2  ;;  %v1076_v61 = vrot.slane %v3159_v7, 2  ;;  %v2806_v32 = vld [vmem:[%s3104_s11 + $0x18] sm:$0xff]   ;;  %v2811_v35 = vld [vmem:[%s3104_s11 + $0xd0] sm:$0xff]   ;;  %v2813_v38 = vld [vmem:[%s3104_s11 + $0x48] sm:$0xff]  }
  0x63   : > { %v1078_v62 = vrot.slane %v3172_v17, 2  ;;  %v1080_v63 = vrot.slane %v3180_v21, 2  ;;  %v959_v0 = vsel %vm948_vm4, %v954_v49, %v958_v45  ;;  %v963_v1 = vsel %vm948_vm4, %v958_v45, %v962_v57  ;;  %v2796_v21 = vld [vmem:[%s3104_s11 + $0xb0] sm:$0xff]   ;;  %v2808_v33 = vld [vmem:[%s3104_s11 + $0x98] sm:$0xff]   ;;  %v2815_v39 = vld [vmem:[%s3104_s11 + $0xc8] sm:$0xff]  }
  0x64   : > { %2631 = vmatpush3.bf16.msra.mxu1 %v2786_v34  ;;  %vm1072_vm5 = vcmask 1045504   ;;  %v841_v3 = vsel %vm836_vm3, %v838_v40, %v840_v41  ;;  %v968_v4 = vor.u32 %v967_v55, %v966_v58  ;;  %v843_v5 = vsel %vm836_vm3, %v840_v41, %v842_v50  ;;  %v2809_v34 = vld [vmem:[%s3104_s11 + $0x50] sm:$0xff]   ;;  %v2814_v40 = vld [vmem:[%s3104_s11 + $0x8] sm:$0xff]   ;;  %v2819_v43 = vld [vmem:[%s3104_s11 + $0xc0] sm:$0xff]  }
  0x65   : > { %2619 = vmatpush3.bf16.msra.mxu0 %v2784_v26  ;;  %v845_v7 = vsel %vm836_vm3, %v842_v50, %v844_v54  ;;  %v1075_v8 = vsel %vm1072_vm5, %v1073_v59, %v1074_v60  ;;  %v1077_v9 = vsel %vm1072_vm5, %v1074_v60, %v1076_v61  ;;  %v1079_v10 = vsel %vm1072_vm5, %v1076_v61, %v1078_v62  ;;  %v2801_v26 = vld [vmem:[%s3104_s11 + $0x60] sm:$0xff]   ;;  %v2810_v36 = vld [vmem:[%s3104_s11 + $0x10] sm:$0xff]   ;;  %v2816_v41 = vld [vmem:[%s3104_s11 + $0x88] sm:$0xff]  }
  0x66   : > { %2613 = vmatmul.mubr.msk.bf16.gmra.mxu1 %vm663_vm1, %v3172_v17  ;;  %2640 = vmatprep.subr.bf16.mxu0 %v2787_v42  ;;  %v969_v6 = vsel %vm948_vm4, %v962_v57, %v968_v4  ;;  %v1081_v11 = vsel %vm1072_vm5, %v1078_v62, %v1080_v63  ;;  %v1182_v12 = vstv %s1181_s0  ;;  %v2792_v17 = vld [vmem:[%s3104_s11 + $0xb8] sm:$0xff]   ;;  %v2812_v37 = vld [vmem:[%s3104_s11 + $0x90] sm:$0xff]   ;;  %v2818_v44 = vld [vmem:[%s3104_s11] sm:$0xff]   ;;  %v2962_v46 = vmov 0.0  }
  0x67   : > { %2632 = vmatprep.mubr.msk.bf16.mxu1 %vm663_vm1, %v955_v56  ;;  %2837 = vrcp.f32 %v1182_v12  ;;  %2499 = vmatprep.subr.bf16.mxu1 %v2789_v14  ;;  %v2820_v45 = vld [vmem:[%s3104_s11 + $0x80] sm:$0xff]   ;;  %vm1331_vm2 = vcmask 1044480   ;;  %vm1351_vm4 = vcmask 1043456  }
  0x68   : > { %2601 = vmatmul.mubr.msk.bf16.gmra.mxu0 %vm663_vm1, %v650_v52 }
  0x69   : > { %2620 = vmatprep.mubr.msk.bf16.mxu0 %vm663_vm1, %v839_v53 }
  0x6e   : > { %2633 = vmatmul.mubr.msk.bf16.vlgmr.msra.gmra.mxu1 %vm663_vm1, %v959_v0  ;;  %v431_v0 = vlaneseq }
  0x6f   : > { %2636 = vmatprep.mubr.msk.bf16.mxu1 %vm663_vm1, %v963_v1  ;;  %2500 = vmatpush3.bf16.msra.mxu1 %v2790_v15 }
  0x70   : > { %2621 = vmatmul.mubr.msk.bf16.vlgmr.msra.gmra.mxu0 %vm663_vm1, %v841_v3  ;;  %2501 = vmatprep.subr.bf16.mxu1 %v2793_v18  ;;  %v3275_v4 = vshrl.u32 %v431_v0, 7 }
  0x71   : > { %2641 = vmatpush3.bf16.msra.mxu0 %v2787_v42  ;;  %2624 = vmatprep.mubr.msk.bf16.mxu0 %vm663_vm1, %v843_v5  ;;  %v2817_v42 = vld [vmem:[%s3104_s11 + $0x40] sm:$0xff]  }
  0x72   : > { %2642 = vmatprep.subr.bf16.mxu0 %v2788_v2  ;;  %v3286_v14 = vadd.s32 8, %v3275_v4 }
  0x73   : > { %2502 = vmatpush3.bf16.msra.mxu1 %v2794_v19 }
  0x74   : > { %v2838_v13 = vpop.eup %2837  ;;  %2503 = vmatprep.subr.bf16.mxu1 %v2797_v22 }
  0x75   : > { %2643 = vmatpush3.bf16.msra.mxu0 %v2788_v2  ;;  %2716 = vpush %v2838_v13 }
  0x76   : > { %2637 = vmatmul.mubr.msk.bf16.gmra.mxu1 %vm663_vm1, %v969_v6  ;;  %2533 = vmatprep.subr.bf16.mxu0 %v2791_v16 }
  0x77   : > { %2504 = vmatpush3.bf16.msra.mxu1 %v2798_v24 }
  0x78   : > { %2625 = vmatmul.mubr.msk.bf16.gmra.mxu0 %vm663_vm1, %v845_v7  ;;  %2505 = vmatprep.subr.bf16.mxu1 %v2801_v26  ;;  %v3298_v26 = vadd.s32 24, %v3275_v4 }
  0x79   : > { %2644 = vmatprep.mubr.msk.bf16.mxu0 %vm663_vm1, %v1075_v8  ;;  %v3279_v8 = vadd.s32 16, %v3275_v4 }
  0x7b   : > { %2506 = vmatpush3.bf16.msra.mxu1 %v2802_v28 }
  0x7c   : > { %2507 = vmatprep.subr.bf16.mxu1 %v2805_v30 }
  0x7f   : > { %2508 = vmatpush3.bf16.msra.mxu1 %v2806_v32 }
  0x80   : > { %2645 = vmatmul.mubr.msk.bf16.vlgmr.msra.gmra.mxu0 %vm663_vm1, %v1077_v9  ;;  %2509 = vmatprep.subr.bf16.mxu1 %v2809_v34 }
  0x81   : > { %2648 = vmatprep.mubr.msk.bf16.mxu0 %vm663_vm1, %v1079_v10  ;;  %2534 = vmatpush3.bf16.msra.mxu0 %v2792_v17  ;;  %v448_v10 = vstv %s422_s29 }
  0x82   : > { %2535 = vmatprep.subr.bf16.mxu0 %v2795_v20  ;;  %vm451_vm6 = vcmp.lt.s32.totalorder %v3279_v8, %v448_v10  ;;  %vm449_vm8 = vcmp.lt.s32.totalorder %v3275_v4, %v448_v10  ;;  %vm450_vm11 = vcmp.lt.s32.totalorder %v3286_v14, %v448_v10 }
  0x83   : > { %2510 = vmatpush3.bf16.msra.mxu1 %v2810_v36  ;;  %v3309_v36 = vadd.s32 32, %v3275_v4 }
  0x84   : > { %2511 = vmatprep.subr.bf16.mxu1 %v2813_v38 }
  0x85   : > { %2536 = vmatpush3.bf16.msra.mxu0 %v2796_v21 }
  0x86   : > { %2537 = vmatprep.subr.bf16.mxu0 %v2799_v23 }
  0x87   : > { %2512 = vmatpush3.bf16.msra.mxu1 %v2814_v40 }
  0x88   : > { %2649 = vmatmul.mubr.msk.bf16.gmra.mxu0 %vm663_vm1, %v1081_v11  ;;  %2513 = vmatprep.subr.bf16.mxu1 %v2817_v42  ;;  %v3283_v11 = vstv %s500_s20 }
  0x89   : > { %2538 = vmatpush3.bf16.msra.mxu0 %v2800_v25  ;;  %vm504_vm7 = vcmp.lt.s32.totalorder %v3279_v8, %v3283_v11  ;;  %vm502_vm9 = vcmp.lt.s32.totalorder %v3275_v4, %v3283_v11  ;;  %vm503_vm12 = vcmp.lt.s32.totalorder %v3286_v14, %v3283_v11  ;;  %vm505_vm15 = vcmp.lt.s32.totalorder %v3298_v26, %v3283_v11 }
  0x8a   : > { %2539 = vmatprep.subr.bf16.mxu0 %v2803_v27  ;;  %vm528_vm10 = vmand %vm451_vm6, %vm504_vm7  ;;  %vm506_vm0 = vcmp.lt.s32.totalorder %v3309_v36, %v3283_v11 }
  0x8b   : > { %2514 = vmatpush3.bf16.msra.mxu1 %v2818_v44  ;;  %vm526_vm13 = vmand %vm449_vm8, %vm502_vm9  ;;  %v3301_v30 = vsel %vm528_vm10, 1.0, %v2962_v46  ;;  %v3340_v0 = vsel %vm506_vm0, 1.0, %v2962_v46 }
  0x8c   : > { %2652 = vmatprep.subr.bf16.mxu1 %v2962_v46  ;;  %vm527_vm14 = vmand %vm450_vm11, %vm503_vm12 }
  0x8d   : > { %2540 = vmatpush3.bf16.msra.mxu0 %v2804_v29  ;;  %v3314_v40 = vsel %vm527_vm14, 1.0, %v2962_v46 }
  0x8e   : > { %2541 = vmatprep.subr.bf16.mxu0 %v2807_v31  ;;  %v3304_v31 = vsel %vm526_vm13, 1.0, %v2962_v46 }
  0x91   : > { %2542 = vmatpush3.bf16.msra.mxu0 %v2808_v33 }
  0x92   : > { %2543 = vmatprep.subr.bf16.mxu0 %v2811_v35 }
  0x95   : > { %2544 = vmatpush3.bf16.msra.mxu0 %v2812_v37 }
  0x96   : > { %2545 = vmatprep.subr.bf16.mxu0 %v2815_v39 }
  0x99   : > { %2546 = vmatpush3.bf16.msra.mxu0 %v2816_v41 }
  0x9a   : > { %2547 = vmatprep.subr.bf16.mxu0 %v2819_v43 }
  0x9d   : > { %2548 = vmatpush3.bf16.msra.mxu0 %v2820_v45  ;;  %v3319_v45 = vadd.s32 40, %v3275_v4 }
  0x9e   : > { %2680 = vmatprep.subr.bf16.mxu0 %v2962_v46 }
  0x9f   : > { %vm507_vm1 = vcmp.lt.s32.totalorder %v3319_v45, %v3283_v11 }
  0xa6   : > { %s2717_s29 = spop %2716 }
 0x11e   : > { %v2610_v47 = vpop.f32.mrf.mxu1 }
 0x120   : > { %v795_v48 = vpop.f32.mrf.mxu1  ;;  %v2598_v49 = vpop.f32.mrf.mxu0 }
 0x121   : > { %v804_v17 = vadd.f32 %v2610_v47, %v2598_v49 }
 0x122   : > { %v2611_v50 = vpop.f32.mrf.mxu1  ;;  %v710_v51 = vpop.f32.mrf.mxu0 }
 0x123   : > { %v796_v15 = vadd.f32 %v795_v48, %v710_v51 }
 0x124   : > { %v798_v52 = vpop.f32.mrf.mxu1  ;;  %v2599_v53 = vpop.f32.mrf.mxu0 }
 0x125   : > { %v807_v20 = vadd.f32 %v2611_v50, %v2599_v53  ;;  %v3327_v53 = vsel %vm505_vm15, 1.0, %v2962_v46 }
 0x126   : > { %v2614_v54 = vpop.f32.mrf.mxu1  ;;  %v713_v55 = vpop.f32.mrf.mxu0 }
 0x127   : > { %v799_v22 = vadd.f32 %v798_v52, %v713_v55 }
 0x128   : > { %v811_v56 = vpop.f32.mrf.mxu1  ;;  %v2602_v57 = vpop.f32.mrf.mxu0 }
 0x129   : > { %v820_v37 = vadd.f32 %v2614_v54, %v2602_v57 }
 0x12a   : > { %v3273_v58 = vpop.f32.mrf.mxu1  ;;  %v726_v59 = vpop.f32.mrf.mxu0 }
 0x12b   : > { %v812_v33 = vadd.f32 %v811_v56, %v726_v59 }
 0x12c   : > { %v814_v60 = vpop.f32.mrf.mxu1  ;;  %v2603_v61 = vpop.f32.mrf.mxu0 }
 0x12d   : > { %v823_v47 = vadd.f32 %v3273_v58, %v2603_v61 }
 0x12e   : > { %v2634_v62 = vpop.f32.mrf.mxu1  ;;  %v729_v63 = vpop.f32.mrf.mxu0 }
 0x12f   : > { %v815_v48 = vadd.f32 %v814_v60, %v729_v63 }
 0x130   : > { %v2622_v1 = vpop.f32.mrf.mxu0  ;;  %v1028_v2 = vpop.f32.mrf.mxu1 }
 0x131   : > { %v937_v23 = vadd.f32 %v2622_v1, %v804_v17 }
 0x132   : > { %v904_v3 = vpop.f32.mrf.mxu0  ;;  %v2635_v6 = vpop.f32.mrf.mxu1 }
 0x133   : > { %v935_v18 = vadd.f32 %v904_v3, %v796_v15  ;;  %v1061_v34 = vadd.f32 %v2634_v62, %v937_v23 }
 0x134   : > { %v2623_v5 = vpop.f32.mrf.mxu0  ;;  %v1031_v12 = vpop.f32.mrf.mxu1 }
 0x135   : > { %v938_v24 = vadd.f32 %v2623_v5, %v807_v20  ;;  %v1059_v27 = vadd.f32 %v1028_v2, %v935_v18  ;;  %v3355_v18 = vsel %vm507_vm1, 1.0, %v2962_v46  ;;  %vm2007_vm1 = vcmask 1041409  }
 0x136   : > { %v907_v7 = vpop.f32.mrf.mxu0  ;;  %v2638_v19 = vpop.f32.mrf.mxu1 }
 0x137   : > { %v936_v28 = vadd.f32 %v907_v7, %v799_v22  ;;  %v1062_v38 = vadd.f32 %v2635_v6, %v938_v24 }
 0x138   : > { %v2626_v9 = vpop.f32.mrf.mxu0  ;;  %v1044_v29 = vpop.f32.mrf.mxu1 }
 0x139   : > { %v1060_v41 = vadd.f32 %v1031_v12, %v936_v28  ;;  %v941_v49 = vadd.f32 %v2626_v9, %v820_v37 }
 0x13a   : > { %v920_v13 = vpop.f32.mrf.mxu0  ;;  %v2639_v43 = vpop.f32.mrf.mxu1 }
 0x13b   : > { %v939_v42 = vadd.f32 %v920_v13, %v812_v33  ;;  %v1065_v62 = vadd.f32 %v2638_v19, %v941_v49 }
 0x13c   : > { %v2627_v16 = vpop.f32.mrf.mxu0  ;;  %v1047_v59 = vpop.f32.mrf.mxu1 }
 0x13d   : > { %v942_v55 = vadd.f32 %v2627_v16, %v823_v47  ;;  %v1063_v58 = vadd.f32 %v1044_v29, %v939_v42 }
 0x13e   : > { %v923_v21 = vpop.f32.mrf.mxu0 }
 0x13f   : > { %v940_v56 = vadd.f32 %v923_v21, %v815_v48  ;;  %v1066_v7 = vadd.f32 %v2639_v43, %v942_v55 }
 0x140   : > { %v2646_v25 = vpop.f32.mrf.mxu0 }
 0x141   : > { %v3316_v44 = vadd.f32 %v2646_v25, %v1061_v34  ;;  %v1064_v9 = vadd.f32 %v1047_v59, %v940_v56 }
 0x142   : > { %v1140_v32 = vpop.f32.mrf.mxu0 }
 0x143   : > { %v3306_v35 = vadd.f32 %v1140_v32, %v1059_v27  ;;  %v1187_v60 = vmul.f32 %v3301_v30, %v3316_v44 }
 0x144   : > { %v2647_v39 = vpop.f32.mrf.mxu0 }
 0x145   : > { %v3322_v50 = vadd.f32 %v2647_v39, %v1062_v38  ;;  %v1185_v52 = vmul.f32 %v3304_v31, %v3306_v35  ;;  %v1210_v13 = vmul.f32 %v1187_v60, %v3316_v44 }
 0x146   : > { %v1143_v51 = vpop.f32.mrf.mxu0 }
 0x147   : > { %v3329_v54 = vadd.f32 %v1143_v51, %v1060_v41  ;;  %v1188_v63 = vmul.f32 %v3327_v53, %v3322_v50  ;;  %v1208_v2 = vmul.f32 %v1185_v52, %v3306_v35 }
 0x148   : > { %v2650_v57 = vpop.f32.mrf.mxu0 }
 0x149   : > { %v1186_v61 = vmul.f32 %v3314_v40, %v3329_v54  ;;  %v3348_v10 = vadd.f32 %v2650_v57, %v1065_v62  ;;  %v1211_v11 = vmul.f32 %v1188_v63, %v3322_v50 }
 0x14a   : > { %v1156_v1 = vpop.f32.mrf.mxu0 }
 0x14b   : > { %v1193_v3 = vadd.f32 %v1186_v61, %v1185_v52  ;;  %v1209_v5 = vmul.f32 %v1186_v61, %v3329_v54  ;;  %v3346_v6 = vadd.f32 %v1156_v1, %v1063_v58  ;;  %v1191_v24 = vmul.f32 0.0, %v3348_v10 }
 0x14c   : > { %v2651_v12 = vpop.f32.mrf.mxu0  ;;  %v1206_v61 = vstv %s2717_s29 }
 0x14d   : > { %v1194_v15 = vadd.f32 %v1193_v3, %v1187_v60  ;;  %v1216_v16 = vadd.f32 %v1209_v5, %v1208_v2  ;;  %v1189_v17 = vmul.f32 %v3340_v0, %v3346_v6  ;;  %v1178_v22 = vadd.f32 %v2651_v12, %v1066_v7 }
 0x14e   : > { %v1159_v19 = vpop.f32.mrf.mxu0  ;;  %v1214_v38 = vmul.f32 %v1191_v24, %v3348_v10  ;;  %v3362_v12 = vsub.s32 0, %v3275_v4 }
 0x14f   : > { %v1217_v20 = vadd.f32 %v1216_v16, %v1210_v13  ;;  %v1195_v21 = vadd.f32 %v1194_v15, %v1188_v63  ;;  %v1176_v23 = vadd.f32 %v1159_v19, %v1064_v9  ;;  %v1212_v27 = vmul.f32 %v1189_v17, %v3346_v6  ;;  %v1179_v13 = vld [vmem:[%s3118_s28] sm:$0x3] }
 0x150   : > { %v1192_v33 = vmul.f32 0.0, %v1178_v22  ;;  %v3366_v15 = vsub.s32 1, %v3275_v4  ;;  %v1251_v16 = vrot.slane %v1179_v13, %v3362_v12 }
 0x151   : > { %v1196_v25 = vadd.f32 %v1195_v21, %v1189_v17  ;;  %v1218_v28 = vadd.f32 %v1217_v20, %v1211_v11  ;;  %v1190_v29 = vmul.f32 %v3355_v18, %v1176_v23 }
 0x152   : > { %v1215_v42 = vmul.f32 %v1192_v33, %v1178_v22  ;;  %v1262_v22 = vrot.slane %v1179_v13, %v3366_v15 }
 0x153   : > { %v1219_v32 = vadd.f32 %v1218_v28, %v1212_v27  ;;  %v1197_v34 = vadd.f32 %v1196_v25, %v1190_v29  ;;  %v1213_v37 = vmul.f32 %v1190_v29, %v1176_v23 }
 0x155   : > { %v1198_v39 = vadd.f32 %v1197_v34, %v1191_v24  ;;  %v1220_v41 = vadd.f32 %v1219_v32, %v1213_v37 }
 0x157   : > { %v1221_v43 = vadd.f32 %v1220_v41, %v1214_v38  ;;  %v1199_v47 = vadd.f32 %v1198_v39, %v1192_v33 }
 0x159   : > { %v1200_v48 = vrot.slane %v1199_v47, 4  ;;  %v1222_v49 = vadd.f32 %v1221_v43, %v1215_v42 }
 0x15b   : > { %v1201_v51 = vadd.f32 %v1200_v48, %v1199_v47  ;;  %v1223_v52 = vrot.slane %v1222_v49, 4 }
 0x15d   : > { %v1202_v55 = vrot.slane %v1201_v51, 2  ;;  %v1224_v56 = vadd.f32 %v1223_v52, %v1222_v49 }
 0x15f   : > { %v1203_v57 = vadd.f32 %v1202_v55, %v1201_v51  ;;  %v1225_v58 = vrot.slane %v1224_v56, 2 }
 0x161   : > { %v1204_v59 = vrot.slane %v1203_v57, 1  ;;  %v1226_v60 = vadd.f32 %v1225_v58, %v1224_v56 }
 0x163   : > { %v1205_v62 = vadd.f32 %v1204_v59, %v1203_v57  ;;  %v1227_v63 = vrot.slane %v1226_v60, 1 }
 0x165   : > { %v1207_v1 = vmul.f32 %v1206_v61, %v1205_v62  ;;  %v1228_v2 = vadd.f32 %v1227_v63, %v1226_v60 }
 0x167   : > { %v1229_v3 = vmul.f32 %v1228_v2, %v1206_v61  ;;  %v1230_v5 = vmul.f32 %v1207_v1, %v1207_v1  ;;  %v1232_v17 = vsub.f32 %v3306_v35, %v1207_v1  ;;  %v1233_v11 = vsub.f32 %v3329_v54, %v1207_v1 }
 0x168   : > { %v1234_v19 = vsub.f32 %v3316_v44, %v1207_v1  ;;  %v1235_v20 = vsub.f32 %v3322_v50, %v1207_v1  ;;  %v1236_v24 = vsub.f32 %v3346_v6, %v1207_v1  ;;  %v1237_v25 = vsub.f32 %v1176_v23, %v1207_v1 }
 0x169   : > { %v1231_v7 = vsub.f32 %v1229_v3, %v1230_v5  ;;  %v1238_v27 = vsub.f32 %v3348_v10, %v1207_v1 }
 0x16b   : > { %v1239_v9 = vadd.f32 1e-05, %v1231_v7 }
 0x16d   : > { %2839 = vrsqrt.f32 %v1239_v9 }
 0x17a   : > { %v2840_v21 = vpop.eup %2839 }
 0x17b   : > { %v1241_v28 = vmul.f32 %v2840_v21, %v1232_v17  ;;  %v1242_v29 = vmul.f32 %v2840_v21, %v1233_v11  ;;  %v1243_v32 = vmul.f32 %v2840_v21, %v1234_v19  ;;  %v1244_v33 = vmul.f32 %v2840_v21, %v1235_v20 }
 0x17c   : > { %v1245_v34 = vmul.f32 %v2840_v21, %v1236_v24  ;;  %v1246_v35 = vmul.f32 %v2840_v21, %v1237_v25  ;;  %v1247_v37 = vmul.f32 %v2840_v21, %v1238_v27  ;;  %v2821_v21 = vld [vmem:[%s3104_s11 + $0x138] sm:$0xff]  }
 0x17d   : > { %v1252_v54 = vmul.f32 %v1251_v16, %v1241_v28  ;;  %v1253_v38 = vmul.f32 %v1251_v16, %v1242_v29  ;;  %v1254_v44 = vmul.f32 %v1251_v16, %v1243_v32  ;;  %v1255_v39 = vmul.f32 %v1251_v16, %v1244_v33 }
 0x17e   : > { %v1256_v50 = vmul.f32 %v1251_v16, %v1245_v34  ;;  %v1257_v41 = vmul.f32 %v1251_v16, %v1246_v35  ;;  %v1258_v42 = vmul.f32 %v1251_v16, %v1247_v37 }
 0x17f   : > { %v1263_v43 = vadd.f32 %v1262_v22, %v1252_v54  ;;  %v1264_v47 = vadd.f32 %v1262_v22, %v1253_v38  ;;  %v1265_v6 = vadd.f32 %v1262_v22, %v1254_v44  ;;  %v1266_v23 = vadd.f32 %v1262_v22, %v1255_v39 }
 0x180   : > { %v1267_v48 = vadd.f32 %v1262_v22, %v1256_v50  ;;  %v1268_v10 = vadd.f32 %v1262_v22, %v1257_v41  ;;  %v1269_v49 = vadd.f32 %v1262_v22, %v1258_v42  ;;  %v2822_v50 = vld [vmem:[%s3104_s11 + $0x130] sm:$0xff]  }
 0x181   : > { %v1270_v51 = vmax.f32 %v1263_v43, 0.0  ;;  %v1271_v52 = vmax.f32 %v1264_v47, 0.0  ;;  %v1272_v55 = vmax.f32 %v1265_v6, 0.0  ;;  %v1273_v56 = vmax.f32 %v1266_v23, 0.0 }
 0x182   : > { %v1274_v57 = vmax.f32 %v1267_v48, 0.0  ;;  %v1275_v58 = vmax.f32 %v1268_v10, 0.0  ;;  %v1276_v59 = vmax.f32 %v1269_v49, 0.0  ;;  %v2823_v10 = vld [vmem:[%s3104_s11 + $0x128] sm:$0xff]  }
 0x183   : > { %v3377_v60 = vmul.f32 %v3304_v31, %v1270_v51  ;;  %v3380_v61 = vmul.f32 %v3314_v40, %v1271_v52  ;;  %v3383_v62 = vmul.f32 %v3301_v30, %v1272_v55  ;;  %v3386_v63 = vmul.f32 %v3327_v53, %v1273_v56 }
 0x184   : > { %v3389_v1 = vmul.f32 %v3340_v0, %v1274_v57  ;;  %v3392_v2 = vmul.f32 %v3355_v18, %v1275_v58  ;;  %v3394_v3 = vmul.f32 0.0, %v1276_v59 }
 0x185   : > { %v1292_v31 = vrot.slane %v3377_v60, 1  ;;  %v1293_v40 = vrot.slane %v3380_v61, 1  ;;  %v1295_v30 = vrot.slane %v3383_v62, 1  ;;  %v1332_v5 = vrot.slane %v3377_v60, 3 }
 0x186   : > { %v1333_v53 = vrot.slane %v3380_v61, 3  ;;  %v1335_v7 = vrot.slane %v3383_v62, 3  ;;  %v1371_v0 = vpack.c.bf16 %v3380_v61, %v3377_v60  ;;  %v1312_v18 = vrot.slane %v3377_v60, 2 }
 0x187   : > { %v1294_v9 = vsel %vm836_vm3, %v1292_v31, %v1293_v40  ;;  %v1296_v13 = vsel %vm836_vm3, %v1293_v40, %v1295_v30  ;;  %v1313_v16 = vrot.slane %v3380_v61, 2  ;;  %v1315_v17 = vrot.slane %v3383_v62, 2 }
 0x188   : > { %v1372_v11 = vpack.c.bf16 %v1296_v13, %v1294_v9  ;;  %v1334_v19 = vsel %vm1331_vm2, %v1332_v5, %v1333_v53  ;;  %v1336_v20 = vsel %vm1331_vm2, %v1333_v53, %v1335_v7  ;;  %v1297_v22 = vrot.slane %v3386_v63, 1  ;;  %v2826_v9 = vld [vmem:[%s3104_s11 + $0x110] sm:$0xff]   ;;  %v2827_v13 = vld [vmem:[%s3104_s11 + $0x108] sm:$0xff]  }
 0x189   : > { %v1374_v24 = vpack.c.bf16 %v1336_v20, %v1334_v19  ;;  %v1314_v25 = vsel %vm1072_vm5, %v1312_v18, %v1313_v16  ;;  %v1316_v27 = vsel %vm1072_vm5, %v1313_v16, %v1315_v17  ;;  %v1299_v28 = vrot.slane %v3389_v1, 1  ;;  %v2828_v19 = vld [vmem:[%s3104_s11 + $0x100] sm:$0xff]  }
 0x18a   : > { %1738 = vmatprep.mubr.bf16.mxu1 %v1372_v11  ;;  %v1373_v29 = vpack.c.bf16 %v1316_v27, %v1314_v25  ;;  %v1298_v32 = vsel %vm836_vm3, %v1295_v30, %v1297_v22  ;;  %v1337_v33 = vrot.slane %v3386_v63, 3  ;;  %v1339_v34 = vrot.slane %v3389_v1, 3  ;;  %v2824_v30 = vld [vmem:[%s3104_s11 + $0x120] sm:$0xff]  }
 0x18b   : > { %1795 = vmatprep.mubr.bf16.mxu0 %v1374_v24  ;;  %1739 = vmatmul.mubr.bf16.vlgmr.msra.gmra.mxu1 %v1371_v0  ;;  %v1300_v35 = vsel %vm836_vm3, %v1297_v22, %v1299_v28  ;;  %v1317_v37 = vrot.slane %v3386_v63, 2  ;;  %v1319_v54 = vrot.slane %v3389_v1, 2  ;;  %v1301_v41 = vrot.slane %v3392_v2, 1 }
 0x18c   : > { %1796 = vmatmul.mubr.bf16.vlgmr.msra.gmra.mxu0 %v1373_v29  ;;  %2653 = vmatpush3.bf16.msra.mxu1 %v2821_v21  ;;  %v1377_v38 = vpack.c.bf16 %v1300_v35, %v1298_v32  ;;  %v1338_v44 = vsel %vm1331_vm2, %v1335_v7, %v1337_v33  ;;  %v1340_v39 = vsel %vm1331_vm2, %v1337_v33, %v1339_v34  ;;  %v1303_v43 = vrot.slane %v3394_v3, 1  ;;  %v2825_v7 = vld [vmem:[%s3104_s11 + $0x118] sm:$0xff]   ;;  %s2448_s11 = sshll.u32 %s3134_s25, 1  ;;  %v2830_v33 = vld [vmem:[%s3139_s27 + $0x30] sm:$0xff]  }
 0x18d   : > { %v1379_v42 = vpack.c.bf16 %v1340_v39, %v1338_v44  ;;  %2654 = vmatprep.subr.bf16.mxu1 %v2962_v46  ;;  %v1341_v47 = vrot.slane %v3392_v2, 3  ;;  %v1343_v6 = vrot.slane %v3394_v3, 3  ;;  %v1318_v23 = vsel %vm1072_vm5, %v1315_v17, %v1317_v37  ;;  %s1879_s28 = scvt.s32.f32 %s2448_s11  ;;  %v2832_v35 = vld [vmem:[%s3139_s27 + $0x20] sm:$0xff]  }
 0x18e   : > { %1746 = vmatprep.mubr.bf16.mxu1 %v1377_v38  ;;  %v1320_v48 = vsel %vm1072_vm5, %v1317_v37, %v1319_v54  ;;  %v1302_v49 = vsel %vm836_vm3, %v1299_v28, %v1301_v41  ;;  %v1304_v51 = vsel %vm836_vm3, %v1301_v41, %v1303_v43  ;;  %v1376_v56 = vpack.c.bf16 %v3386_v63, %v3383_v62  ;;  %v2833_v37 = vld [vmem:[%s3139_s27 + $0x18] sm:$0xff]   ;;  %v2835_v38 = vld [vmem:[%s3139_s27 + $0x8] sm:$0xff]   ;;  %v2836_v44 = vld [vmem:[%s3139_s27] sm:$0xff]  }
 0x18f   : > { %1803 = vmatprep.mubr.bf16.mxu0 %v1379_v42  ;;  %v1342_v52 = vsel %vm1331_vm2, %v1339_v34, %v1341_v47  ;;  %v1344_v55 = vsel %vm1331_vm2, %v1341_v47, %v1343_v6  ;;  %v1378_v57 = vpack.c.bf16 %v1320_v48, %v1318_v23  ;;  %v1382_v58 = vpack.c.bf16 %v1304_v51, %v1302_v49  ;;  %v2831_v34 = vld [vmem:[%s3139_s27 + $0x28] sm:$0xff]  }
 0x190   : > { %2655 = vmatpush3.bf16.msra.mxu1 %v2822_v50  ;;  %v1384_v59 = vpack.c.bf16 %v1344_v55, %v1342_v52  ;;  %v1321_v31 = vrot.slane %v3392_v2, 2  ;;  %v1323_v40 = vrot.slane %v3394_v3, 2  ;;  %v1381_v0 = vpack.c.bf16 %v3392_v2, %v3389_v1 }
 0x191   : > { %2656 = vmatprep.subr.bf16.mxu1 %v2962_v46  ;;  %vm2963_vm3 = vmmov 0   ;;  %v1352_v16 = vrot.slane %v3377_v60, 4  ;;  %v1353_v17 = vrot.slane %v3380_v61, 4  ;;  %v1355_v11 = vrot.slane %v3383_v62, 4 }
 0x192   : > { %v1322_v5 = vsel %vm1072_vm5, %v1319_v54, %v1321_v31  ;;  %v1324_v53 = vsel %vm1072_vm5, %v1321_v31, %v1323_v40  ;;  %v1357_v24 = vrot.slane %v3386_v63, 4  ;;  %v1359_v60 = vrot.slane %v3389_v1, 4  ;;  %v2834_v54 = vld [vmem:[%s3139_s27 + $0x10] sm:$0xff]  }
 0x193   : > { %1747 = vmatmul.mubr.bf16.gmra.mxu1 %v1376_v56  ;;  %v1383_v18 = vpack.c.bf16 %v1324_v53, %v1322_v5  ;;  %v1354_v20 = vsel %vm1351_vm4, %v1352_v16, %v1353_v17  ;;  %v1356_v21 = vsel %vm1351_vm4, %v1353_v17, %v1355_v11  ;;  %v1361_v27 = vrot.slane %v3392_v2, 4 }
 0x194   : > { %1804 = vmatmul.mubr.bf16.gmra.mxu0 %v1378_v57  ;;  %2657 = vmatpush3.bf16.msra.mxu1 %v2823_v10  ;;  %v1375_v22 = vpack.c.bf16 %v1356_v21, %v1354_v20  ;;  %v1358_v61 = vsel %vm1351_vm4, %v1355_v11, %v1357_v24  ;;  %v1360_v62 = vsel %vm1351_vm4, %v1357_v24, %v1359_v60  ;;  %v1363_v28 = vrot.slane %v3394_v3, 4  ;;  %v2829_v3 = vld [vmem:[%s3139_s27 + $0x38] sm:$0xff]   ;;  %s534_s27 = ssub.s32 50, %s2342_s3 }
 0x195   : > { %1754 = vmatprep.mubr.bf16.mxu1 %v1382_v58  ;;  %1811 = vmatprep.mubr.bf16.mxu0 %v1384_v59  ;;  %v1380_v25 = vpack.c.bf16 %v1360_v62, %v1358_v61  ;;  %v1362_v63 = vsel %vm1351_vm4, %v1359_v60, %v1361_v27  ;;  %v1880_v32 = vstv %s1879_s28  ;;  %v481_v5 = vstv %s3134_s25 }
 0x196   : > { %2658 = vmatprep.subr.bf16.mxu1 %v2962_v46  ;;  %v1364_v1 = vsel %vm1351_vm4, %v1361_v27, %v1363_v28  ;;  %2841 = vrcp.f32 %v1880_v32  ;;  %2681 = vmatpush3.bf16.msra.mxu0 %v2829_v3  ;;  %v3496_v53 = vstv %s534_s27  ;;  %vm483_vm5 = vcmp.lt.s32.totalorder %v3286_v14, %v481_v5 }
 0x197   : > { %v1385_v29 = vpack.c.bf16 %v1364_v1, %v1362_v63  ;;  %2682 = vmatprep.subr.bf16.mxu0 %v2962_v46  ;;  %vm537_vm6 = vcmp.lt.s32.totalorder %v3286_v14, %v3496_v53  ;;  %vm482_vm7 = vcmp.lt.s32.totalorder %v3275_v4, %v481_v5  ;;  %vm536_vm8 = vcmp.lt.s32.totalorder %v3275_v4, %v3496_v53 }
 0x198   : > { %2659 = vmatpush3.bf16.msra.mxu1 %v2824_v30  ;;  %vm484_vm9 = vcmp.lt.s32.totalorder %v3279_v8, %v481_v5  ;;  %vm538_vm10 = vcmp.lt.s32.totalorder %v3279_v8, %v3496_v53  ;;  %vm549_vm11 = vmand %vm483_vm5, %vm537_vm6  ;;  %vm539_vm14 = vcmp.lt.s32.totalorder %v3298_v26, %v3496_v53  ;;  %vm540_vm15 = vcmp.lt.s32.totalorder %v3309_v36, %v3496_v53 }
 0x199   : > { %2660 = vmatprep.subr.bf16.mxu1 %v2962_v46  ;;  %vm548_vm12 = vmand %vm482_vm7, %vm536_vm8  ;;  %v3510_v4 = vsel %vm549_vm11, 1.0, %v2962_v46  ;;  %vm541_vm0 = vcmp.lt.s32.totalorder %v3319_v45, %v3496_v53  ;;  %vm2100_vm2 = vcmask 517120  }
 0x19a   : > { %2683 = vmatpush3.bf16.msra.mxu0 %v2830_v33  ;;  %vm550_vm13 = vmand %vm484_vm9, %vm538_vm10  ;;  %v3519_v8 = vsel %vm548_vm12, 1.0, %v2962_v46 }
 0x19b   : > { %1755 = vmatmul.mubr.bf16.gmra.mxu1 %v1381_v0  ;;  %2684 = vmatprep.subr.bf16.mxu0 %v2962_v46  ;;  %v3522_v1 = vsel %vm550_vm13, 1.0, %v2962_v46 }
 0x19c   : > { %1812 = vmatmul.mubr.bf16.gmra.mxu0 %v1383_v18  ;;  %2661 = vmatpush3.bf16.msra.mxu1 %v2825_v7 }
 0x19d   : > { %2662 = vmatprep.subr.bf16.mxu1 %v2962_v46  ;;  %2668 = vmatprep.mubr.msk.bf16.mxu1 %vm2963_vm3, %v2962_v46 }
 0x19e   : > { %2696 = vmatprep.mubr.msk.bf16.mxu0 %vm2963_vm3, %v2962_v46  ;;  %2685 = vmatpush3.bf16.msra.mxu0 %v2831_v34 }
 0x19f   : > { %2686 = vmatprep.subr.bf16.mxu0 %v2962_v46 }
 0x1a0   : > { %2663 = vmatpush3.bf16.msra.mxu1 %v2826_v9 }
 0x1a1   : > { %2664 = vmatprep.subr.bf16.mxu1 %v2962_v46 }
 0x1a2   : > { %2687 = vmatpush3.bf16.msra.mxu0 %v2832_v35  ;;  %v3527_v35 = vsel %vm539_vm14, 1.0, %v2962_v46 }
 0x1a3   : > { %v2842_v2 = vpop.eup %2841  ;;  %2688 = vmatprep.subr.bf16.mxu0 %v2962_v46 }
 0x1a4   : > { %2665 = vmatpush3.bf16.msra.mxu1 %v2827_v13  ;;  %2718 = vpush %v2842_v2 }
 0x1a5   : > { %2666 = vmatprep.subr.bf16.mxu1 %v2962_v46 }
 0x1a6   : > { %2689 = vmatpush3.bf16.msra.mxu0 %v2833_v37 }
 0x1a7   : > { %2690 = vmatprep.subr.bf16.mxu0 %v2962_v46 }
 0x1a8   : > { %2667 = vmatpush3.bf16.msra.mxu1 %v2828_v19 }
 0x1aa   : > { %2691 = vmatpush3.bf16.msra.mxu0 %v2834_v54 }
 0x1ab   : > { %2669 = vmatmul.mubr.bf16.vlgmr.msra.gmra.mxu1 %v1375_v22  ;;  %2692 = vmatprep.subr.bf16.mxu0 %v2962_v46 }
 0x1ac   : > { %2672 = vmatprep.mubr.msk.bf16.mxu1 %vm2963_vm3, %v2962_v46 }
 0x1ae   : > { %2693 = vmatpush3.bf16.msra.mxu0 %v2835_v38 }
 0x1af   : > { %2694 = vmatprep.subr.bf16.mxu0 %v2962_v46 }
 0x1b2   : > { %2695 = vmatpush3.bf16.msra.mxu0 %v2836_v44 }
 0x1b3   : > { %2673 = vmatmul.mubr.bf16.gmra.mxu1 %v1380_v25 }
 0x1b4   : > { %2676 = vmatprep.mubr.msk.bf16.mxu1 %vm2963_vm3, %v2962_v46 }
 0x1bb   : > { %2677 = vmatmul.mubr.bf16.gmra.mxu1 %v1385_v29 }
 0x1d5   : > { %s2719_s3 = spop %2718 }
 0x24b   : > { %v2515_v39 = vpop.f32.mrf.mxu1 }
 0x24c   : > { %v2549_v50 = vpop.f32.mrf.mxu0 }
 0x24d   : > { %v2516_v41 = vpop.f32.mrf.mxu1 }
 0x24e   : > { %v2550_v42 = vpop.f32.mrf.mxu0  ;;  %v2517_v9 = vadd.f32 %v2516_v41, %v2515_v39 }
 0x24f   : > { %v2518_v43 = vpop.f32.mrf.mxu1  ;;  %v2551_v13 = vadd.f32 %v2550_v42, %v2549_v50 }
 0x250   : > { %v2552_v6 = vpop.f32.mrf.mxu0 }
 0x251   : > { %v2519_v47 = vpop.f32.mrf.mxu1  ;;  %v1798_v22 = vadd.f32 %v2551_v13, %v2517_v9 }
 0x252   : > { %v2553_v10 = vpop.f32.mrf.mxu0  ;;  %v2520_v0 = vadd.f32 %v2519_v47, %v2518_v43  ;;  %v3541_v47 = vsel %vm540_vm15, 1.0, %v2962_v46 }
 0x253   : > { %v2521_v23 = vpop.f32.mrf.mxu1  ;;  %v2554_v18 = vadd.f32 %v2553_v10, %v2552_v6 }
 0x254   : > { %v2555_v52 = vpop.f32.mrf.mxu0 }
 0x255   : > { %v2522_v48 = vpop.f32.mrf.mxu1  ;;  %v1801_v21 = vadd.f32 %v2554_v18, %v2520_v0 }
 0x256   : > { %v2556_v56 = vpop.f32.mrf.mxu0  ;;  %v2523_v17 = vadd.f32 %v2522_v48, %v2521_v23 }
 0x257   : > { %v2524_v49 = vpop.f32.mrf.mxu1  ;;  %v2557_v11 = vadd.f32 %v2556_v56, %v2555_v52 }
 0x258   : > { %v2558_v58 = vpop.f32.mrf.mxu0 }
 0x259   : > { %v2525_v51 = vpop.f32.mrf.mxu1  ;;  %v1806_v25 = vadd.f32 %v2557_v11, %v2523_v17 }
 0x25a   : > { %v2559_v31 = vpop.f32.mrf.mxu0  ;;  %v2526_v14 = vadd.f32 %v2525_v51, %v2524_v49 }
 0x25b   : > { %v2527_v55 = vpop.f32.mrf.mxu1  ;;  %v2560_v60 = vadd.f32 %v2559_v31, %v2558_v58  ;;  %v3550_v58 = vsel %vm541_vm0, 1.0, %v2962_v46 }
 0x25c   : > { %v2561_v30 = vpop.f32.mrf.mxu0 }
 0x25d   : > { %v2528_v57 = vpop.f32.mrf.mxu1  ;;  %v1809_v34 = vadd.f32 %v2560_v60, %v2526_v14  ;;  %v1900_v60 = vstv %s2719_s3 }
 0x25e   : > { %v2562_v19 = vpop.f32.mrf.mxu0  ;;  %v2529_v32 = vadd.f32 %v2528_v57, %v2527_v55 }
 0x25f   : > { %v2530_v59 = vpop.f32.mrf.mxu1  ;;  %v2563_v2 = vadd.f32 %v2562_v19, %v2561_v30 }
 0x260   : > { %v2564_v61 = vpop.f32.mrf.mxu0 }
 0x261   : > { %v2531_v40 = vpop.f32.mrf.mxu1  ;;  %v1814_v43 = vadd.f32 %v2563_v2, %v2529_v32 }
 0x262   : > { %v2565_v3 = vpop.f32.mrf.mxu0  ;;  %v2532_v44 = vadd.f32 %v2531_v40, %v2530_v59 }
 0x263   : > { %v2566_v39 = vadd.f32 %v2565_v3, %v2564_v61 }
 0x265   : > { %v1817_v51 = vadd.f32 %v2566_v39, %v2532_v44 }
 0x26b   : > { %v1854_v7 = vpop.f32.mrf.mxu1 }
 0x26c   : > { %v3512_v28 = vadd.f32 %v1854_v7, %v1798_v22 }
 0x26d   : > { %v2670_v16 = vpop.f32.mrf.mxu1 }
 0x26e   : > { %v1883_v26 = vmul.f32 %v3519_v8, %v3512_v28 }
 0x26f   : > { %v1857_v20 = vpop.f32.mrf.mxu1 }
 0x270   : > { %v3507_v62 = vadd.f32 %v1857_v20, %v1801_v21  ;;  %v1902_v23 = vmul.f32 %v1883_v26, %v3512_v28 }
 0x271   : > { %v2671_v24 = vpop.f32.mrf.mxu1 }
 0x272   : > { %v1884_v33 = vmul.f32 %v3510_v4, %v3507_v62 }
 0x273   : > { %v1862_v27 = vpop.f32.mrf.mxu1 }
 0x274   : > { %v3514_v63 = vadd.f32 %v1862_v27, %v1806_v25  ;;  %v1903_v41 = vmul.f32 %v1884_v33, %v3507_v62  ;;  %v1889_v48 = vadd.f32 %v1884_v33, %v1883_v26 }
 0x275   : > { %v2674_v29 = vpop.f32.mrf.mxu1 }
 0x276   : > { %v1885_v54 = vmul.f32 %v3522_v1, %v3514_v63  ;;  %v1908_v52 = vadd.f32 %v1903_v41, %v1902_v23 }
 0x277   : > { %v1865_v37 = vpop.f32.mrf.mxu1 }
 0x278   : > { %v3533_v38 = vadd.f32 %v1865_v37, %v1809_v34  ;;  %v1904_v36 = vmul.f32 %v1885_v54, %v3514_v63  ;;  %v1890_v55 = vadd.f32 %v1889_v48, %v1885_v54  ;;  %v1877_v34 = vld [vmem:[%s3123_s14] sm:$0x3] }
 0x279   : > { %v2675_v50 = vpop.f32.mrf.mxu1  ;;  %v1939_v37 = vrot.slane %v1877_v34, %v3362_v12 }
 0x27a   : > { %v1886_v42 = vmul.f32 %v3527_v35, %v3533_v38  ;;  %v1909_v31 = vadd.f32 %v1908_v52, %v1904_v36 }
 0x27b   : > { %v1870_v6 = vpop.f32.mrf.mxu1 }
 0x27c   : > { %v1871_v10 = vadd.f32 %v1870_v6, %v1814_v43  ;;  %v1905_v56 = vmul.f32 %v1886_v42, %v3533_v38  ;;  %v1891_v45 = vadd.f32 %v1890_v55, %v1886_v42  ;;  %v1949_v43 = vrot.slane %v1877_v34, %v3366_v15  ;;  %v1984_v34 = vld [vmem:[#allocation2] sm:$0x3] }
 0x27d   : > { %v2678_v49 = vpop.f32.mrf.mxu1 }
 0x27e   : > { %v1887_v57 = vmul.f32 %v3541_v47, %v1871_v10  ;;  %v1910_v53 = vadd.f32 %v1909_v31, %v1905_v56 }
 0x27f   : > { %v1873_v59 = vpop.f32.mrf.mxu1 }
 0x280   : > { %v1906_v40 = vmul.f32 %v1887_v57, %v1871_v10  ;;  %v1874_v30 = vadd.f32 %v1873_v59, %v1817_v51  ;;  %v1892_v7 = vadd.f32 %v1891_v45, %v1887_v57 }
 0x281   : > { %v2679_v5 = vpop.f32.mrf.mxu1 }
 0x282   : > { %v1888_v0 = vmul.f32 %v3550_v58, %v1874_v30  ;;  %v1911_v18 = vadd.f32 %v1910_v53, %v1906_v40 }
 0x284   : > { %v1893_v9 = vadd.f32 %v1892_v7, %v1888_v0  ;;  %v1907_v13 = vmul.f32 %v1888_v0, %v1874_v30 }
 0x286   : > { %v1912_v16 = vadd.f32 %v1911_v18, %v1907_v13  ;;  %v1894_v17 = vrot.slane %v1893_v9, 4 }
 0x288   : > { %v1895_v11 = vadd.f32 %v1894_v17, %v1893_v9  ;;  %v1913_v19 = vrot.slane %v1912_v16, 4 }
 0x28a   : > { %v1896_v20 = vrot.slane %v1895_v11, 2  ;;  %v1914_v46 = vadd.f32 %v1913_v19, %v1912_v16 }
 0x28c   : > { %v1897_v21 = vadd.f32 %v1896_v20, %v1895_v11  ;;  %v1915_v22 = vrot.slane %v1914_v46, 2 }
 0x28e   : > { %v1898_v24 = vrot.slane %v1897_v21, 1  ;;  %v1916_v14 = vadd.f32 %v1915_v22, %v1914_v46 }
 0x290   : > { %v1899_v61 = vadd.f32 %v1898_v24, %v1897_v21  ;;  %v1917_v25 = vrot.slane %v1916_v14, 1 }
 0x292   : > { %v1901_v27 = vmul.f32 %v1900_v60, %v1899_v61  ;;  %v1918_v29 = vadd.f32 %v1917_v25, %v1916_v14 }
 0x294   : > { %v1919_v32 = vmul.f32 %v1918_v29, %v1900_v60  ;;  %v1920_v2 = vmul.f32 %v1901_v27, %v1901_v27  ;;  %v1922_v26 = vsub.f32 %v3512_v28, %v1901_v27  ;;  %v1923_v54 = vsub.f32 %v3507_v62, %v1901_v27 }
 0x295   : > { %v1924_v44 = vsub.f32 %v3514_v63, %v1901_v27  ;;  %v1925_v39 = vsub.f32 %v3533_v38, %v1901_v27  ;;  %v1926_v41 = vsub.f32 %v1871_v10, %v1901_v27  ;;  %v1927_v42 = vsub.f32 %v1874_v30, %v1901_v27 }
 0x296   : > { %v1921_v3 = vsub.f32 %v1919_v32, %v1920_v2 }
 0x298   : > { %v1928_v33 = vadd.f32 1e-05, %v1921_v3 }
 0x29a   : > { %2843 = vrsqrt.f32 %v1928_v33 }
 0x2a7   : > { %v2844_v50 = vpop.eup %2843 }
 0x2a8   : > { %v1930_v6 = vmul.f32 %v2844_v50, %v1922_v26  ;;  %v1931_v23 = vmul.f32 %v2844_v50, %v1923_v54  ;;  %v1932_v48 = vmul.f32 %v2844_v50, %v1924_v44  ;;  %v1933_v36 = vmul.f32 %v2844_v50, %v1925_v39 }
 0x2a9   : > { %v1934_v49 = vmul.f32 %v2844_v50, %v1926_v41  ;;  %v1935_v51 = vmul.f32 %v2844_v50, %v1927_v42 }
 0x2aa   : > { %v1940_v52 = vmul.f32 %v1939_v37, %v1930_v6  ;;  %v1941_v55 = vmul.f32 %v1939_v37, %v1931_v23  ;;  %v1942_v28 = vmul.f32 %v1939_v37, %v1932_v48  ;;  %v1943_v56 = vmul.f32 %v1939_v37, %v1933_v36 }
 0x2ab   : > { %v1944_v62 = vmul.f32 %v1939_v37, %v1934_v49  ;;  %v1945_v57 = vmul.f32 %v1939_v37, %v1935_v51 }
 0x2ac   : > { %v1950_v63 = vadd.f32 %v1949_v43, %v1940_v52  ;;  %v1951_v59 = vadd.f32 %v1949_v43, %v1941_v55  ;;  %v1952_v38 = vadd.f32 %v1949_v43, %v1942_v28  ;;  %v1953_v31 = vadd.f32 %v1949_v43, %v1943_v56 }
 0x2ad   : > { %v1954_v10 = vadd.f32 %v1949_v43, %v1944_v62  ;;  %v1955_v45 = vadd.f32 %v1949_v43, %v1945_v57 }
 0x2ae   : > { %v1956_v40 = vmax.f32 %v1950_v63, 0.0  ;;  %v1957_v30 = vmax.f32 %v1951_v59, 0.0  ;;  %v1958_v5 = vmax.f32 %v1952_v38, 0.0  ;;  %v1959_v53 = vmax.f32 %v1953_v31, 0.0 }
 0x2af   : > { %v1960_v7 = vmax.f32 %v1954_v10, 0.0  ;;  %v1961_v0 = vmax.f32 %v1955_v45, 0.0 }
 0x2b0   : > { %v1962_v18 = vmul.f32 %v3519_v8, %v1956_v40  ;;  %v1964_v9 = vmul.f32 %v3522_v1, %v1958_v5  ;;  %v1965_v13 = vmul.f32 %v3527_v35, %v1959_v53  ;;  %v1963_v17 = vmul.f32 %v3510_v4, %v1957_v30 }
 0x2b1   : > { %v1967_v16 = vmul.f32 %v3550_v58, %v1961_v0  ;;  %v1966_v19 = vmul.f32 %v3541_v47, %v1960_v7 }
 0x2b2   : > { %v1968_v11 = vmax.f32 %v1962_v18, %v1964_v9 }
 0x2b3   : > { %v1976_v20 = vmax.f32 %v1965_v13, %v1967_v16 }
 0x2b4   : > { %v1969_v46 = vmax.f32 %v1968_v11, %v1963_v17 }
 0x2b5   : > { %v1977_v21 = vmax.f32 %v1976_v20, %v1966_v19 }
 0x2b6   : > { %v1970_v22 = vrot.slane %v1969_v46, 4 }
 0x2b7   : > { %v1978_v24 = vrot.slane %v1977_v21, 4 }
 0x2b8   : > { %v1971_v14 = vmax.f32 %v1969_v46, %v1970_v22 }
 0x2b9   : > { %v1979_v60 = vmax.f32 %v1977_v21, %v1978_v24 }
 0x2ba   : > { %v1972_v61 = vrot.slane %v1971_v14, 2 }
 0x2bb   : > { %v1980_v8 = vrot.slane %v1979_v60, 2 }
 0x2bc   : > { %v1973_v25 = vmax.f32 %v1971_v14, %v1972_v61 }
 0x2bd   : > { %v1981_v1 = vmax.f32 %v1979_v60, %v1980_v8 }
 0x2be   : > { %v1974_v27 = vrot.slane %v1973_v25, 1 }
 0x2bf   : > { %v1982_v35 = vrot.slane %v1981_v1, 1 }
 0x2c0   : > { %v1975_v29 = vmax.f32 %v1973_v25, %v1974_v27 }
 0x2c1   : > { %v1983_v58 = vmax.f32 %v1981_v1, %v1982_v35 }
 0x2c2   : > { %v1985_v32 = vpack.c.bf16 %v1975_v29, %v1975_v29 }
 0x2c3   : > { %v1986_v4 = vpack.c.bf16 %v1983_v58, %v1983_v58 }
 0x2c4   : > { %v2005_v2 = vunpack.c.l.b16 %v1985_v32 }
 0x2c5   : > { %v2006_v47 = vunpack.c.l.b16 %v1986_v4 }
 0x2c7   : > { %v2008_v3 = vsel %vm2007_vm1, %v2006_v47, %v2005_v2 }
 0x2c8   : > { %v2009_v33 = vpack.c.b16 %v2008_v3, %v2008_v3 }
 0x2ca   : > { %2697 = vmatmul.mubr.bf16.vlgmr.msra.gmra.mxu0 %v2009_v33 }
 0x38a   : > { %v2093_v37 = vpop.f32.mrf.mxu0 }
 0x38b   : > { %v2099_v26 = vadd.f32 %v2093_v37, %v1984_v34 }
 0x38c   : > { %v2698_v54 = vpop.f32.mrf.mxu0  ;;  %2105 = sbr.rel (%p2457_p6) target bundleno = 1161 (0x489), region = 68 }
 0x38d   : > { %2101 = vst.msk [vmem:[#allocation2] sm:$0x3] %vm2100_vm2, %v2099_v26 }
 0x38e   : > { %v2096_v44 = vpop.f32.mrf.mxu0 }
 0x390   : > { %v2699_v39 = vpop.f32.mrf.mxu0 }
 0x391   : > { %v2845_v50 = vld [vmem:[%s3623_s8 + $0x18] sm:$0xff]   ;;  %v2964_v41 = vmov 0.0   ;;  %v2846_v42 = vld [vmem:[%s3623_s8 + $0x10] sm:$0xff]   ;;  %vm2965_vm3 = vmmov 0   ;;  %v2847_v48 = vld [vmem:[%s3623_s8 + $0x8] sm:$0xff]   ;;  %vm2182_vm4 = vcmask 523264  }
 0x392   : > { %2700 = vmatprep.subr.bf16.mxu0 %v2964_v41  ;;  %2708 = vmatprep.mubr.msk.bf16.mxu0 %vm2965_vm3, %v2964_v41  ;;  %v2848_v55 = vld [vmem:[%s3623_s8] sm:$0xff]  }
 0x393   : > { %2701 = vmatpush3.bf16.msra.mxu0 %v2845_v50  ;;  %v2107_v7 = vld [vmem:[%s3622_s7] sm:$0x3] }
 0x394   : > { %2702 = vmatprep.subr.bf16.mxu0 %v2964_v41  ;;  %v2106_v43 = vld [vmem:[#allocation2] sm:$0x3]  ;;  %v2134_v18 = vrot.slane %v2107_v7, %v3362_v12  ;;  %v2139_v16 = vrot.slane %v2107_v7, %v3366_v15 }
 0x395   : > { %v2108_v6 = vsel %vm2100_vm2, %v2106_v43, 0.0  ;;  %v2116_v23 = vmul.f32 %v2106_v43, %v2106_v43  ;;  %v2458_v46 = vld [vmem:[%s3624_s9] ss:$0 sm:$0xff] }
 0x396   : > { %v2109_v36 = vrot.slane %v2108_v6, 4 }
 0x397   : > { %2703 = vmatpush3.bf16.msra.mxu0 %v2846_v42  ;;  %v2117_v49 = vsel %vm2100_vm2, %v2116_v23, 0.0 }
 0x398   : > { %2704 = vmatprep.subr.bf16.mxu0 %v2964_v41  ;;  %v2110_v51 = vadd.f32 %v2109_v36, %v2108_v6  ;;  %v2118_v52 = vrot.slane %v2117_v49, 4 }
 0x39a   : > { %v2111_v28 = vrot.slane %v2110_v51, 2  ;;  %v2119_v56 = vadd.f32 %v2118_v52, %v2117_v49 }
 0x39b   : > { %2705 = vmatpush3.bf16.msra.mxu0 %v2847_v48 }
 0x39c   : > { %2706 = vmatprep.subr.bf16.mxu0 %v2964_v41  ;;  %v2112_v62 = vadd.f32 %v2111_v28, %v2110_v51  ;;  %v2120_v57 = vrot.slane %v2119_v56, 2 }
 0x39e   : > { %v2113_v63 = vrot.slane %v2112_v62, 1  ;;  %v2121_v59 = vadd.f32 %v2120_v57, %v2119_v56 }
 0x39f   : > { %2707 = vmatpush3.bf16.msra.mxu0 %v2848_v55 }
 0x3a0   : > { %v2114_v38 = vadd.f32 %v2113_v63, %v2112_v62  ;;  %v2122_v31 = vrot.slane %v2121_v59, 1 }
 0x3a2   : > { %v2115_v10 = vmul.f32 0.5, %v2114_v38  ;;  %v2123_v45 = vadd.f32 %v2122_v31, %v2121_v59 }
 0x3a4   : > { %v2124_v40 = vmul.f32 0.5, %v2123_v45  ;;  %v2125_v30 = vmul.f32 %v2115_v10, %v2115_v10  ;;  %v2127_v0 = vsub.f32 %v2106_v43, %v2115_v10 }
 0x3a6   : > { %v2126_v5 = vsub.f32 %v2124_v40, %v2125_v30 }
 0x3a8   : > { %v2128_v53 = vadd.f32 1e-05, %v2126_v5 }
 0x3aa   : > { %2849 = vrsqrt.f32 %v2128_v53 }
 0x3b7   : > { %v2850_v9 = vpop.eup %2849 }
 0x3b8   : > { %v2130_v13 = vmul.f32 %v2850_v9, %v2127_v0 }
 0x3ba   : > { %v2135_v17 = vmul.f32 %v2134_v18, %v2130_v13 }
 0x3bc   : > { %v2140_v11 = vadd.f32 %v2139_v16, %v2135_v17 }
 0x3be   : > { %v2141_v19 = vmax.f32 %v2140_v11, 0.0 }
 0x3c0   : > { %v2142_v20 = vpack.c.bf16 %v2141_v19, %v2141_v19 }
 0x3c2   : > { %2709 = vmatmul.mubr.msk.bf16.vlgmr.msra.gmra.mxu0 %vm2182_vm4, %v2142_v20 }
 0x482   : > { %v2220_v21 = vpop.f32.mrf.mxu0 }
 0x483   : > { %v2221_v22 = vadd.f32 %v2458_v46, %v2220_v21 }
 0x484   : > { %v2710_v24 = vpop.f32.mrf.mxu0 }
 0x485   : > { %2226 = vst [vmem:[#allocation8] sm:$0x3] %v2221_v22 }
 0x486   : > { %v2223_v14 = vpop.f32.mrf.mxu0 }
 0x488   : > { %v2711_v12 = vpop.f32.mrf.mxu0 }
 0x489 PF: > { %p2731_p7 = scmp.eq.s32.totalorder %s3044_s21, 3  ;;  %s2966_s0 = smov [#allocation8]  }
 0x48a   : > { %s2234_s20 = sshll.u32 %s2966_s0, 4  ;;  %s2235_s20 = int_to_ptr.vmem [resolvable:$true] %s2234_s20 }
 0x48b   : > { %s2891_s29 = scalar_lea.vmem %s2235_s20, 32  ;;  %p2898_p11 = scmp.lt.s32.totalorder %s2235_s20, %s2235_s20 }
 0x48c   : > { %p2892_p8 = scmp.ne.s32.totalorder %s2235_s20, %s2891_s29  ;;  %p2899_p1 = scmp.lt.s32.totalorder %s2891_s29, %s2891_s29 }
 0x48e   : > { %p2893_p9 = pnand %p2892_p8, %p2731_p7  ;;  %p2900_p3 = por %p2899_p1, %p2898_p11 }
 0x490   : > { %p2894_p10 = pneg %p2893_p9 }
 0x492   : > { %p2901_p2 = pnand %p2900_p3, %p2894_p10 }
 0x494   : > { %2904 = shalt.err (!%p2901_p2)
}
 0x495   : > { %2723 = dma.vmem_to_hbm [thread:$0]  (%p2731_p7), %s2235_s20, 32, %s3625_s10, [#allocation7]  }
 0x496   : > { %2938 = dma.done.wait (%p2731_p7), [#allocation7], 32  }
 0x497   : > { %2940 = vsyncadd (%p2731_p7), [#allocation7], 4294967264 }
 0x498 PF: > { %s3636_s27 = sld [smem:[#allocation12_spill]]  ;;  %p27_p4 = scmp.ge.s32.totalorder %s3047_s22, 6  }
 0x499   : > { %s3637_s0 = sld [smem:[#allocation13_spill]]  ;;  %s3638_s18 = smov %s2947_s19 }
 0x49a   : > { %s3640_s20 = smov %s3047_s22  ;;  %29 = sbr.rel (!%p27_p4) target bundleno = 19 (0x13), region = 117 }
 0x49e   : > { %s3639_s19 = smov %s3636_s27 }
 0x49f   :  { %2247 = vsyncpa [#allocation6], 1 }
 0x4a0   :  { %2249 = vsyncpa [#allocation6 + $0x1], 1 }
 0x4a1   :  { %2250 = vsyncpa [#allocation7], 1 }
 0x4a2   :  { %2252 = vsyncpa [#allocation7 + $0x1], 1 }

</bundles_post_ra>
